<compile_context>
chip_gen: v6e
topology: v6e:2x2x1
jax: 0.10.0
libtpu: 0.0.40
codegen_flags: <defaults>
</compile_context>

<pallas_src>
import jax
import jax.numpy as jnp
import numpy as np
from jax import lax
from jax.experimental import pallas as pl
from jax.experimental.pallas import tpu as pltpu


def _round_up(x, m):
    return ((x + m - 1) // m) * m


def _vmem_limit_bytes():
    """Generation-aware scoped-VMEM limit (~3/4 of physical, capped at 96 MiB)."""
    try:
        cap = int(pltpu.get_tpu_info().vmem_capacity_bytes)
    except Exception:
        cap = 64 * 1024 * 1024            # conservative (v7x-sized) fallback
    return min((cap * 3) // 4, 96 * 1024 * 1024)


def _pick_rows_per_block(batch, height, width, c_in, op, vmem_budget, row_cap=8):
    """Largest legal Rh (divides H; multiple of 8 or == H) within cap & VMEM budget."""
    def footprint(r):
        io_blocks = 2 * 2 * c_in * r * width * 4          # x + out blocks, double-buffered
        per_row = (3 * width * width * 4                   # s / p / attn  (f32)
                   + 3 * op * width * 4                    # qkv slab (+ bf16 copies)
                   + 2 * c_in * width * 4)                 # out / residual temporaries
        weights = 2 * (op * c_in + op) * 4
        return io_blocks + min(r, 4) * per_row + weights   # ~<=4 rows in flight at once

    legal = sorted(r for r in range(1, height + 1)
                   if height % r == 0 and (r % 8 == 0 or r == height))
    best = legal[0]
    for r in legal:
        if r <= row_cap and footprint(r) <= vmem_budget:
            best = r
    # Keep >= 2 total grid steps when a legal alternative exists (pipelining + v7x megacore).
    if batch * (height // best) < 2:
        for r in reversed(legal):
            if r < best and footprint(r) <= vmem_budget:
                best = r
                break
    return best


def _make_row_attention_kernel(rh, qk_pad, c_in):
    def kernel(x_ref, w_ref, b_ref, gamma_ref, o_ref):
        # x_ref / o_ref: (1, C, Rh, W);  w_ref: (Op, C);  b_ref: (Op, 1);  gamma: SMEM (1,)
        gamma = gamma_ref[0]
        w_bf = w_ref[...].astype(jnp.bfloat16)            # hoisted out of the row loop
        bias = b_ref[...]                                 # (Op, 1) f32

        for r in range(rh):                               # static unroll over the Rh rows
            x_r = x_ref[0, :, r, :]                       # (C, W) f32, W on lanes

            # Fused QKV projection: one MXU matmul (bf16 in, f32 accumulate).
            qkv = jnp.dot(w_bf, x_r.astype(jnp.bfloat16),
                          preferred_element_type=jnp.float32) + bias      # (Op, W)
            q = qkv[:qk_pad, :]                           # (QKp, W) — sublane-aligned slices
            k = qkv[qk_pad:2 * qk_pad, :]                 # (QKp, W)
            v = qkv[2 * qk_pad:, :]                       # (Cp,  W)

            # Row attention scores: s[wq, wk] = sum_d q[d, wq] * k[d, wk]
            s = jnp.dot(q.T.astype(jnp.bfloat16), k.astype(jnp.bfloat16),
                        preferred_element_type=jnp.float32)               # (W, W) f32

            # Softmax over the key axis (lanes), all in f32 (v5e-safe).
            m = jnp.max(s, axis=-1, keepdims=True)
            p = jnp.exp(s - m)
            l = jnp.sum(p, axis=-1, keepdims=True)
            attn = p * pl.reciprocal(l, approx=True)      # EUP reciprocal, off the VALU path

            # out[c, wq] = sum_wk v[c, wk] * attn[wq, wk]   (rhs-transposed matmul)
            out = lax.dot_general(v.astype(jnp.bfloat16), attn.astype(jnp.bfloat16),
                                  dimension_numbers=(((1,), (1,)), ((), ())),
                                  preferred_element_type=jnp.float32)     # (Cp, W)

            o_ref[0, :, r, :] = gamma * out[:c_in, :] + x_r
    return kernel


def row_attention(x, wq, bq, wk, bk, wv, bv, gamma, *, donate_input=False):
    """x: (B, C, H, W) f32.  wq/wk: (qk, C), wv: (C, C), biases 1-D, gamma: (1,)."""
    b, c, h, w = x.shape
    qk = wq.shape[0]
    qk_pad = _round_up(qk, 8)
    c_pad = _round_up(c, 8)
    op = 2 * qk_pad + c_pad

    # Fused, sublane-aligned [Wq; Wk; Wv] weight / bias (zero-padded segments).
    w_f = jnp.zeros((op, c), jnp.float32)
    w_f = (w_f.at[:qk].set(wq)
              .at[qk_pad:qk_pad + qk].set(wk)
              .at[2 * qk_pad:2 * qk_pad + c].set(wv))
    b_f = jnp.zeros((op, 1), jnp.float32)
    b_f = (b_f.at[:qk, 0].set(bq)
              .at[qk_pad:qk_pad + qk, 0].set(bk)
              .at[2 * qk_pad:2 * qk_pad + c, 0].set(bv))

    vmem_limit = _vmem_limit_bytes()
    rh = _pick_rows_per_block(b, h, w, c, op, (vmem_limit * 7) // 10)
    grid = (b, h // rh)

    kernel = _make_row_attention_kernel(rh, qk_pad, c)
    extra = {"input_output_aliases": {0: 0}} if donate_input else {}

    return pl.pallas_call(
        kernel,
        out_shape=jax.ShapeDtypeStruct((b, c, h, w), jnp.float32),
        grid_spec=pltpu.PrefetchScalarGridSpec(
            num_scalar_prefetch=0,
            grid=grid,
            in_specs=[
                pl.BlockSpec((1, c, rh, w), lambda bi, i: (bi, 0, i, 0)),   # x row-block
                pl.BlockSpec((op, c), lambda bi, i: (0, 0)),                # fused weights
                pl.BlockSpec((op, 1), lambda bi, i: (0, 0)),                # fused bias
                pl.BlockSpec(memory_space=pltpu.MemorySpace.SMEM),          # gamma scalar
            ],
            out_specs=pl.BlockSpec((1, c, rh, w), lambda bi, i: (bi, 0, i, 0)),
        ),
        compiler_params=pltpu.CompilerParams(
            dimension_semantics=("parallel", "parallel"),   # batch x row-block, both independent
            vmem_limit_bytes=int(vmem_limit),
        ),
        **extra,
    )(x, w_f, b_f, gamma.reshape(1))


def ref_row_attention(x, wq, bq, wk, bk, wv, bv, gamma):
    """Pure-JAX reference mirroring the PyTorch forward exactly (all f32)."""
    b, c, h, w = x.shape
    q = jnp.einsum('bchw,oc->bohw', x, wq) + bq[None, :, None, None]
    k = jnp.einsum('bchw,oc->bohw', x, wk) + bk[None, :, None, None]
    v = jnp.einsum('bchw,oc->bohw', x, wv) + bv[None, :, None, None]
    Q = jnp.transpose(q, (0, 2, 1, 3)).reshape(b * h, -1, w).transpose(0, 2, 1)  # (BH, W, qk)
    K = jnp.transpose(k, (0, 2, 1, 3)).reshape(b * h, -1, w)                     # (BH, qk, W)
    V = jnp.transpose(v, (0, 2, 1, 3)).reshape(b * h, -1, w)                     # (BH, C, W)
    attn = jax.nn.softmax(jnp.einsum('bwc,bcv->bwv', Q, K), axis=2)
    out = jnp.einsum('bcv,bwv->bcw', V, attn)
    out = jnp.transpose(out.reshape(b, h, c, w), (0, 2, 1, 3))
    return gamma[0] * out + x


if __name__ == "__main__":
    # Small, module-consistent shapes: batch=2, in_dim=4, q_k_dim=8, H=W=16.
    B, C, H, W = 2, 4, 16, 16
    QK = 8

    key = jax.random.PRNGKey(0)
    kx, kq, kk, kv, kbq, kbk, kbv = jax.random.split(key, 7)

    x = jax.random.normal(kx, (B, C, H, W), dtype=jnp.float32)
    # Conv2d(kernel_size=1) weights: (out, in, 1, 1) -> stored squeezed as (out, in).
    wq = 0.1 * jax.random.normal(kq, (QK, C), dtype=jnp.float32)
    wk = 0.1 * jax.random.normal(kk, (QK, C), dtype=jnp.float32)
    wv = 0.1 * jax.random.normal(kv, (C, C), dtype=jnp.float32)
    bq = 0.1 * jax.random.normal(kbq, (QK,), dtype=jnp.float32)
    bk = 0.1 * jax.random.normal(kbk, (QK,), dtype=jnp.float32)
    bv = 0.1 * jax.random.normal(kbv, (C,), dtype=jnp.float32)
    # The module initializes gamma to 0 (residual-only); use a nonzero value so the
    # attention path is actually exercised in this synthetic test.
    gamma = jnp.array([0.5], dtype=jnp.float32)

    out = jax.block_until_ready(row_attention(x, wq, bq, wk, bk, wv, bv, gamma))
    ref = ref_row_attention(x, wq, bq, wk, bk, wv, bv, gamma)

    assert out.shape == (B, C, H, W)
    # Tolerance reflects bf16 MXU operands (f32 accumulation) plus the EUP approx
    # reciprocal in the softmax denominator; observed deviations are ~1e-3.
    assert np.allclose(np.asarray(out), np.asarray(ref), atol=2e-2, rtol=2e-2)

    print("KERNEL_OK")
</pallas_src>

<mosaic_0001>
module attributes {stable_mosaic.version = 11 : i64} {
  func.func @kernel(%arg0: i32, %arg1: i32, %arg2: memref<1x4x8x16xf32, #tpu.memory_space<vmem>>, %arg3: memref<24x4xf32, #tpu.memory_space<vmem>>, %arg4: memref<24x1xf32, #tpu.memory_space<vmem>>, %arg5: memref<1xf32, #tpu.memory_space<smem>>, %arg6: memref<1x4x8x16xf32, #tpu.memory_space<vmem>>) attributes {dimension_semantics = [#tpu.dimension_semantics<parallel>, #tpu.dimension_semantics<parallel>], iteration_bounds = array<i64: 2, 2>, scalar_prefetch = 0 : i64, scratch_operands = 0 : i64, tpu.core_type = #tpu.core_type<tc>, window_params = [{transform_indices = @transform_0, window_bounds = array<i64: 1, 4, 8, 16>}, {pipeline_mode = #tpu.pipeline_mode<synchronous>, transform_indices = @transform_1, window_bounds = array<i64: 24, 4>}, {pipeline_mode = #tpu.pipeline_mode<synchronous>, transform_indices = @transform_2, window_bounds = array<i64: 24, 1>}, {transform_indices = @transform_3, window_bounds = array<i64: 1>}, {transform_indices = @transform_4, window_bounds = array<i64: 1, 4, 8, 16>}]} {
    %c0 = arith.constant 0 : index
    %0 = memref.load %arg5[%c0] : memref<1xf32, #tpu.memory_space<smem>>
    %c0_0 = arith.constant 0 : index
    %c0_1 = arith.constant 0 : index
    %1 = vector.load %arg3[%c0_0, %c0_1] : memref<24x4xf32, #tpu.memory_space<vmem>>, vector<24x4xf32>
    %2 = arith.truncf %1 : vector<24x4xf32> to vector<24x4xbf16>
    %c0_2 = arith.constant 0 : index
    %c0_3 = arith.constant 0 : index
    %3 = vector.load %arg4[%c0_2, %c0_3] : memref<24x1xf32, #tpu.memory_space<vmem>>, vector<24x1xf32>
    %c0_4 = arith.constant 0 : index
    %c0_5 = arith.constant 0 : index
    %c0_6 = arith.constant 0 : index
    %c0_7 = arith.constant 0 : index
    %4 = vector.load %arg2[%c0_4, %c0_5, %c0_6, %c0_7] : memref<1x4x8x16xf32, #tpu.memory_space<vmem>>, vector<1x4x1x16xf32>
    %5 = vector.shape_cast %4 : vector<1x4x1x16xf32> to vector<4x16xf32>
    %6 = arith.truncf %5 : vector<4x16xf32> to vector<4x16xbf16>
    %cst = arith.constant dense<0.000000e+00> : vector<24x16xf32>
    %7 = tpu.matmul %2, %6, %cst {dimension_numbers = #tpu.dot_dimension_numbers<[1], [0], [0], [1], [0, 0, 1, 1], [], []>} : vector<24x4xbf16>, vector<4x16xbf16>, vector<24x16xf32> -> vector<24x16xf32>
    %8 = vector.broadcast %3 : vector<24x1xf32> to vector<24x16xf32>
    %9 = arith.addf %7, %8 : vector<24x16xf32>
    %10 = vector.extract_strided_slice %9 {offsets = [0, 0], sizes = [8, 16], strides = [1, 1]} : vector<24x16xf32> to vector<8x16xf32>
    %11 = vector.extract_strided_slice %9 {offsets = [8, 0], sizes = [8, 16], strides = [1, 1]} : vector<24x16xf32> to vector<8x16xf32>
    %12 = vector.extract_strided_slice %9 {offsets = [16, 0], sizes = [8, 16], strides = [1, 1]} : vector<24x16xf32> to vector<8x16xf32>
    %13 = tpu.transpose %10, [1, 0] : vector<8x16xf32> -> vector<16x8xf32>
    %14 = arith.truncf %13 : vector<16x8xf32> to vector<16x8xbf16>
    %15 = arith.truncf %11 : vector<8x16xf32> to vector<8x16xbf16>
    %cst_8 = arith.constant dense<0.000000e+00> : vector<16x16xf32>
    %16 = tpu.matmul %14, %15, %cst_8 {dimension_numbers = #tpu.dot_dimension_numbers<[1], [0], [0], [1], [0, 0, 1, 1], [], []>} : vector<16x8xbf16>, vector<8x16xbf16>, vector<16x16xf32> -> vector<16x16xf32>
    %cst_9 = arith.constant dense<0xFF800000> : vector<16xf32>
    %17 = vector.multi_reduction <maximumf>, %16, %cst_9 [1] : vector<16x16xf32> to vector<16xf32>
    %18 = vector.shape_cast %17 : vector<16xf32> to vector<16x1xf32>
    %19 = vector.broadcast %18 : vector<16x1xf32> to vector<16x16xf32>
    %20 = arith.subf %16, %19 : vector<16x16xf32>
    %21 = math.exp %20 : vector<16x16xf32>
    %cst_10 = arith.constant dense<0.000000e+00> : vector<16xf32>
    %22 = vector.multi_reduction <add>, %21, %cst_10 [1] : vector<16x16xf32> to vector<16xf32>
    %23 = vector.shape_cast %22 : vector<16xf32> to vector<16x1xf32>
    %24 = tpu.reciprocal %23 {approx = true} : vector<16x1xf32> -> vector<16x1xf32>
    %25 = vector.broadcast %24 : vector<16x1xf32> to vector<16x16xf32>
    %26 = arith.mulf %21, %25 : vector<16x16xf32>
    %27 = arith.truncf %12 : vector<8x16xf32> to vector<8x16xbf16>
    %28 = arith.truncf %26 : vector<16x16xf32> to vector<16x16xbf16>
    %cst_11 = arith.constant dense<0.000000e+00> : vector<8x16xf32>
    %29 = tpu.matmul %27, %28, %cst_11 {dimension_numbers = #tpu.dot_dimension_numbers<[1], [1], [0], [0], [0, 0, 1, 0], [], []>} : vector<8x16xbf16>, vector<16x16xbf16>, vector<8x16xf32> -> vector<8x16xf32>
    %30 = vector.extract_strided_slice %29 {offsets = [0, 0], sizes = [4, 16], strides = [1, 1]} : vector<8x16xf32> to vector<4x16xf32>
    %31 = vector.broadcast %0 : f32 to vector<4x16xf32>
    %32 = arith.mulf %31, %30 : vector<4x16xf32>
    %33 = arith.addf %32, %5 : vector<4x16xf32>
    %c0_12 = arith.constant 0 : index
    %c0_13 = arith.constant 0 : index
    %c0_14 = arith.constant 0 : index
    %c0_15 = arith.constant 0 : index
    %34 = vector.load %arg6[%c0_12, %c0_13, %c0_14, %c0_15] : memref<1x4x8x16xf32, #tpu.memory_space<vmem>>, vector<1x4x1x16xf32>
    %35 = vector.shape_cast %34 : vector<1x4x1x16xf32> to vector<4x16xf32>
    %36 = vector.shape_cast %33 : vector<4x16xf32> to vector<1x4x1x16xf32>
    tpu.vector_store %arg6[%c0_12, %c0_13, %c0_14, %c0_15], %36 {strides = array<i32>} : memref<1x4x8x16xf32, #tpu.memory_space<vmem>>, vector<1x4x1x16xf32>,
    %c0_16 = arith.constant 0 : index
    %c0_17 = arith.constant 0 : index
    %c1 = arith.constant 1 : index
    %c0_18 = arith.constant 0 : index
    %37 = vector.load %arg2[%c0_16, %c0_17, %c1, %c0_18] : memref<1x4x8x16xf32, #tpu.memory_space<vmem>>, vector<1x4x1x16xf32>
    %38 = vector.shape_cast %37 : vector<1x4x1x16xf32> to vector<4x16xf32>
    %39 = arith.truncf %38 : vector<4x16xf32> to vector<4x16xbf16>
    %cst_19 = arith.constant dense<0.000000e+00> : vector<24x16xf32>
    %40 = tpu.matmul %2, %39, %cst_19 {dimension_numbers = #tpu.dot_dimension_numbers<[1], [0], [0], [1], [0, 0, 1, 1], [], []>} : vector<24x4xbf16>, vector<4x16xbf16>, vector<24x16xf32> -> vector<24x16xf32>
    %41 = vector.broadcast %3 : vector<24x1xf32> to vector<24x16xf32>
    %42 = arith.addf %40, %41 : vector<24x16xf32>
    %43 = vector.extract_strided_slice %42 {offsets = [0, 0], sizes = [8, 16], strides = [1, 1]} : vector<24x16xf32> to vector<8x16xf32>
    %44 = vector.extract_strided_slice %42 {offsets = [8, 0], sizes = [8, 16], strides = [1, 1]} : vector<24x16xf32> to vector<8x16xf32>
    %45 = vector.extract_strided_slice %42 {offsets = [16, 0], sizes = [8, 16], strides = [1, 1]} : vector<24x16xf32> to vector<8x16xf32>
    %46 = tpu.transpose %43, [1, 0] : vector<8x16xf32> -> vector<16x8xf32>
    %47 = arith.truncf %46 : vector<16x8xf32> to vector<16x8xbf16>
    %48 = arith.truncf %44 : vector<8x16xf32> to vector<8x16xbf16>
    %cst_20 = arith.constant dense<0.000000e+00> : vector<16x16xf32>
    %49 = tpu.matmul %47, %48, %cst_20 {dimension_numbers = #tpu.dot_dimension_numbers<[1], [0], [0], [1], [0, 0, 1, 1], [], []>} : vector<16x8xbf16>, vector<8x16xbf16>, vector<16x16xf32> -> vector<16x16xf32>
    %cst_21 = arith.constant dense<0xFF800000> : vector<16xf32>
    %50 = vector.multi_reduction <maximumf>, %49, %cst_21 [1] : vector<16x16xf32> to vector<16xf32>
    %51 = vector.shape_cast %50 : vector<16xf32> to vector<16x1xf32>
    %52 = vector.broadcast %51 : vector<16x1xf32> to vector<16x16xf32>
    %53 = arith.subf %49, %52 : vector<16x16xf32>
    %54 = math.exp %53 : vector<16x16xf32>
    %cst_22 = arith.constant dense<0.000000e+00> : vector<16xf32>
    %55 = vector.multi_reduction <add>, %54, %cst_22 [1] : vector<16x16xf32> to vector<16xf32>
    %56 = vector.shape_cast %55 : vector<16xf32> to vector<16x1xf32>
    %57 = tpu.reciprocal %56 {approx = true} : vector<16x1xf32> -> vector<16x1xf32>
    %58 = vector.broadcast %57 : vector<16x1xf32> to vector<16x16xf32>
    %59 = arith.mulf %54, %58 : vector<16x16xf32>
    %60 = arith.truncf %45 : vector<8x16xf32> to vector<8x16xbf16>
    %61 = arith.truncf %59 : vector<16x16xf32> to vector<16x16xbf16>
    %cst_23 = arith.constant dense<0.000000e+00> : vector<8x16xf32>
    %62 = tpu.matmul %60, %61, %cst_23 {dimension_numbers = #tpu.dot_dimension_numbers<[1], [1], [0], [0], [0, 0, 1, 0], [], []>} : vector<8x16xbf16>, vector<16x16xbf16>, vector<8x16xf32> -> vector<8x16xf32>
    %63 = vector.extract_strided_slice %62 {offsets = [0, 0], sizes = [4, 16], strides = [1, 1]} : vector<8x16xf32> to vector<4x16xf32>
    %64 = vector.broadcast %0 : f32 to vector<4x16xf32>
    %65 = arith.mulf %64, %63 : vector<4x16xf32>
    %66 = arith.addf %65, %38 : vector<4x16xf32>
    %c0_24 = arith.constant 0 : index
    %c0_25 = arith.constant 0 : index
    %c1_26 = arith.constant 1 : index
    %c0_27 = arith.constant 0 : index
    %67 = vector.load %arg6[%c0_24, %c0_25, %c1_26, %c0_27] : memref<1x4x8x16xf32, #tpu.memory_space<vmem>>, vector<1x4x1x16xf32>
    %68 = vector.shape_cast %67 : vector<1x4x1x16xf32> to vector<4x16xf32>
    %69 = vector.shape_cast %66 : vector<4x16xf32> to vector<1x4x1x16xf32>
    tpu.vector_store %arg6[%c0_24, %c0_25, %c1_26, %c0_27], %69 {strides = array<i32>} : memref<1x4x8x16xf32, #tpu.memory_space<vmem>>, vector<1x4x1x16xf32>,
    %c0_28 = arith.constant 0 : index
    %c0_29 = arith.constant 0 : index
    %c2 = arith.constant 2 : index
    %c0_30 = arith.constant 0 : index
    %70 = vector.load %arg2[%c0_28, %c0_29, %c2, %c0_30] : memref<1x4x8x16xf32, #tpu.memory_space<vmem>>, vector<1x4x1x16xf32>
    %71 = vector.shape_cast %70 : vector<1x4x1x16xf32> to vector<4x16xf32>
    %72 = arith.truncf %71 : vector<4x16xf32> to vector<4x16xbf16>
    %cst_31 = arith.constant dense<0.000000e+00> : vector<24x16xf32>
    %73 = tpu.matmul %2, %72, %cst_31 {dimension_numbers = #tpu.dot_dimension_numbers<[1], [0], [0], [1], [0, 0, 1, 1], [], []>} : vector<24x4xbf16>, vector<4x16xbf16>, vector<24x16xf32> -> vector<24x16xf32>
    %74 = vector.broadcast %3 : vector<24x1xf32> to vector<24x16xf32>
    %75 = arith.addf %73, %74 : vector<24x16xf32>
    %76 = vector.extract_strided_slice %75 {offsets = [0, 0], sizes = [8, 16], strides = [1, 1]} : vector<24x16xf32> to vector<8x16xf32>
    %77 = vector.extract_strided_slice %75 {offsets = [8, 0], sizes = [8, 16], strides = [1, 1]} : vector<24x16xf32> to vector<8x16xf32>
    %78 = vector.extract_strided_slice %75 {offsets = [16, 0], sizes = [8, 16], strides = [1, 1]} : vector<24x16xf32> to vector<8x16xf32>
    %79 = tpu.transpose %76, [1, 0] : vector<8x16xf32> -> vector<16x8xf32>
    %80 = arith.truncf %79 : vector<16x8xf32> to vector<16x8xbf16>
    %81 = arith.truncf %77 : vector<8x16xf32> to vector<8x16xbf16>
    %cst_32 = arith.constant dense<0.000000e+00> : vector<16x16xf32>
    %82 = tpu.matmul %80, %81, %cst_32 {dimension_numbers = #tpu.dot_dimension_numbers<[1], [0], [0], [1], [0, 0, 1, 1], [], []>} : vector<16x8xbf16>, vector<8x16xbf16>, vector<16x16xf32> -> vector<16x16xf32>
    %cst_33 = arith.constant dense<0xFF800000> : vector<16xf32>
    %83 = vector.multi_reduction <maximumf>, %82, %cst_33 [1] : vector<16x16xf32> to vector<16xf32>
    %84 = vector.shape_cast %83 : vector<16xf32> to vector<16x1xf32>
    %85 = vector.broadcast %84 : vector<16x1xf32> to vector<16x16xf32>
    %86 = arith.subf %82, %85 : vector<16x16xf32>
    %87 = math.exp %86 : vector<16x16xf32>
    %cst_34 = arith.constant dense<0.000000e+00> : vector<16xf32>
    %88 = vector.multi_reduction <add>, %87, %cst_34 [1] : vector<16x16xf32> to vector<16xf32>
    %89 = vector.shape_cast %88 : vector<16xf32> to vector<16x1xf32>
    %90 = tpu.reciprocal %89 {approx = true} : vector<16x1xf32> -> vector<16x1xf32>
    %91 = vector.broadcast %90 : vector<16x1xf32> to vector<16x16xf32>
    %92 = arith.mulf %87, %91 : vector<16x16xf32>
    %93 = arith.truncf %78 : vector<8x16xf32> to vector<8x16xbf16>
    %94 = arith.truncf %92 : vector<16x16xf32> to vector<16x16xbf16>
    %cst_35 = arith.constant dense<0.000000e+00> : vector<8x16xf32>
    %95 = tpu.matmul %93, %94, %cst_35 {dimension_numbers = #tpu.dot_dimension_numbers<[1], [1], [0], [0], [0, 0, 1, 0], [], []>} : vector<8x16xbf16>, vector<16x16xbf16>, vector<8x16xf32> -> vector<8x16xf32>
    %96 = vector.extract_strided_slice %95 {offsets = [0, 0], sizes = [4, 16], strides = [1, 1]} : vector<8x16xf32> to vector<4x16xf32>
    %97 = vector.broadcast %0 : f32 to vector<4x16xf32>
    %98 = arith.mulf %97, %96 : vector<4x16xf32>
    %99 = arith.addf %98, %71 : vector<4x16xf32>
    %c0_36 = arith.constant 0 : index
    %c0_37 = arith.constant 0 : index
    %c2_38 = arith.constant 2 : index
    %c0_39 = arith.constant 0 : index
    %100 = vector.load %arg6[%c0_36, %c0_37, %c2_38, %c0_39] : memref<1x4x8x16xf32, #tpu.memory_space<vmem>>, vector<1x4x1x16xf32>
    %101 = vector.shape_cast %100 : vector<1x4x1x16xf32> to vector<4x16xf32>
    %102 = vector.shape_cast %99 : vector<4x16xf32> to vector<1x4x1x16xf32>
    tpu.vector_store %arg6[%c0_36, %c0_37, %c2_38, %c0_39], %102 {strides = array<i32>} : memref<1x4x8x16xf32, #tpu.memory_space<vmem>>, vector<1x4x1x16xf32>,
    %c0_40 = arith.constant 0 : index
    %c0_41 = arith.constant 0 : index
    %c3 = arith.constant 3 : index
    %c0_42 = arith.constant 0 : index
    %103 = vector.load %arg2[%c0_40, %c0_41, %c3, %c0_42] : memref<1x4x8x16xf32, #tpu.memory_space<vmem>>, vector<1x4x1x16xf32>
    %104 = vector.shape_cast %103 : vector<1x4x1x16xf32> to vector<4x16xf32>
    %105 = arith.truncf %104 : vector<4x16xf32> to vector<4x16xbf16>
    %cst_43 = arith.constant dense<0.000000e+00> : vector<24x16xf32>
    %106 = tpu.matmul %2, %105, %cst_43 {dimension_numbers = #tpu.dot_dimension_numbers<[1], [0], [0], [1], [0, 0, 1, 1], [], []>} : vector<24x4xbf16>, vector<4x16xbf16>, vector<24x16xf32> -> vector<24x16xf32>
    %107 = vector.broadcast %3 : vector<24x1xf32> to vector<24x16xf32>
    %108 = arith.addf %106, %107 : vector<24x16xf32>
    %109 = vector.extract_strided_slice %108 {offsets = [0, 0], sizes = [8, 16], strides = [1, 1]} : vector<24x16xf32> to vector<8x16xf32>
    %110 = vector.extract_strided_slice %108 {offsets = [8, 0], sizes = [8, 16], strides = [1, 1]} : vector<24x16xf32> to vector<8x16xf32>
    %111 = vector.extract_strided_slice %108 {offsets = [16, 0], sizes = [8, 16], strides = [1, 1]} : vector<24x16xf32> to vector<8x16xf32>
    %112 = tpu.transpose %109, [1, 0] : vector<8x16xf32> -> vector<16x8xf32>
    %113 = arith.truncf %112 : vector<16x8xf32> to vector<16x8xbf16>
    %114 = arith.truncf %110 : vector<8x16xf32> to vector<8x16xbf16>
    %cst_44 = arith.constant dense<0.000000e+00> : vector<16x16xf32>
    %115 = tpu.matmul %113, %114, %cst_44 {dimension_numbers = #tpu.dot_dimension_numbers<[1], [0], [0], [1], [0, 0, 1, 1], [], []>} : vector<16x8xbf16>, vector<8x16xbf16>, vector<16x16xf32> -> vector<16x16xf32>
    %cst_45 = arith.constant dense<0xFF800000> : vector<16xf32>
    %116 = vector.multi_reduction <maximumf>, %115, %cst_45 [1] : vector<16x16xf32> to vector<16xf32>
    %117 = vector.shape_cast %116 : vector<16xf32> to vector<16x1xf32>
    %118 = vector.broadcast %117 : vector<16x1xf32> to vector<16x16xf32>
    %119 = arith.subf %115, %118 : vector<16x16xf32>
    %120 = math.exp %119 : vector<16x16xf32>
    %cst_46 = arith.constant dense<0.000000e+00> : vector<16xf32>
    %121 = vector.multi_reduction <add>, %120, %cst_46 [1] : vector<16x16xf32> to vector<16xf32>
    %122 = vector.shape_cast %121 : vector<16xf32> to vector<16x1xf32>
    %123 = tpu.reciprocal %122 {approx = true} : vector<16x1xf32> -> vector<16x1xf32>
    %124 = vector.broadcast %123 : vector<16x1xf32> to vector<16x16xf32>
    %125 = arith.mulf %120, %124 : vector<16x16xf32>
    %126 = arith.truncf %111 : vector<8x16xf32> to vector<8x16xbf16>
    %127 = arith.truncf %125 : vector<16x16xf32> to vector<16x16xbf16>
    %cst_47 = arith.constant dense<0.000000e+00> : vector<8x16xf32>
    %128 = tpu.matmul %126, %127, %cst_47 {dimension_numbers = #tpu.dot_dimension_numbers<[1], [1], [0], [0], [0, 0, 1, 0], [], []>} : vector<8x16xbf16>, vector<16x16xbf16>, vector<8x16xf32> -> vector<8x16xf32>
    %129 = vector.extract_strided_slice %128 {offsets = [0, 0], sizes = [4, 16], strides = [1, 1]} : vector<8x16xf32> to vector<4x16xf32>
    %130 = vector.broadcast %0 : f32 to vector<4x16xf32>
    %131 = arith.mulf %130, %129 : vector<4x16xf32>
    %132 = arith.addf %131, %104 : vector<4x16xf32>
    %c0_48 = arith.constant 0 : index
    %c0_49 = arith.constant 0 : index
    %c3_50 = arith.constant 3 : index
    %c0_51 = arith.constant 0 : index
    %133 = vector.load %arg6[%c0_48, %c0_49, %c3_50, %c0_51] : memref<1x4x8x16xf32, #tpu.memory_space<vmem>>, vector<1x4x1x16xf32>
    %134 = vector.shape_cast %133 : vector<1x4x1x16xf32> to vector<4x16xf32>
    %135 = vector.shape_cast %132 : vector<4x16xf32> to vector<1x4x1x16xf32>
    tpu.vector_store %arg6[%c0_48, %c0_49, %c3_50, %c0_51], %135 {strides = array<i32>} : memref<1x4x8x16xf32, #tpu.memory_space<vmem>>, vector<1x4x1x16xf32>,
    %c0_52 = arith.constant 0 : index
    %c0_53 = arith.constant 0 : index
    %c4 = arith.constant 4 : index
    %c0_54 = arith.constant 0 : index
    %136 = vector.load %arg2[%c0_52, %c0_53, %c4, %c0_54] : memref<1x4x8x16xf32, #tpu.memory_space<vmem>>, vector<1x4x1x16xf32>
    %137 = vector.shape_cast %136 : vector<1x4x1x16xf32> to vector<4x16xf32>
    %138 = arith.truncf %137 : vector<4x16xf32> to vector<4x16xbf16>
    %cst_55 = arith.constant dense<0.000000e+00> : vector<24x16xf32>
    %139 = tpu.matmul %2, %138, %cst_55 {dimension_numbers = #tpu.dot_dimension_numbers<[1], [0], [0], [1], [0, 0, 1, 1], [], []>} : vector<24x4xbf16>, vector<4x16xbf16>, vector<24x16xf32> -> vector<24x16xf32>
    %140 = vector.broadcast %3 : vector<24x1xf32> to vector<24x16xf32>
    %141 = arith.addf %139, %140 : vector<24x16xf32>
    %142 = vector.extract_strided_slice %141 {offsets = [0, 0], sizes = [8, 16], strides = [1, 1]} : vector<24x16xf32> to vector<8x16xf32>
    %143 = vector.extract_strided_slice %141 {offsets = [8, 0], sizes = [8, 16], strides = [1, 1]} : vector<24x16xf32> to vector<8x16xf32>
    %144 = vector.extract_strided_slice %141 {offsets = [16, 0], sizes = [8, 16], strides = [1, 1]} : vector<24x16xf32> to vector<8x16xf32>
    %145 = tpu.transpose %142, [1, 0] : vector<8x16xf32> -> vector<16x8xf32>
    %146 = arith.truncf %145 : vector<16x8xf32> to vector<16x8xbf16>
    %147 = arith.truncf %143 : vector<8x16xf32> to vector<8x16xbf16>
    %cst_56 = arith.constant dense<0.000000e+00> : vector<16x16xf32>
    %148 = tpu.matmul %146, %147, %cst_56 {dimension_numbers = #tpu.dot_dimension_numbers<[1], [0], [0], [1], [0, 0, 1, 1], [], []>} : vector<16x8xbf16>, vector<8x16xbf16>, vector<16x16xf32> -> vector<16x16xf32>
    %cst_57 = arith.constant dense<0xFF800000> : vector<16xf32>
    %149 = vector.multi_reduction <maximumf>, %148, %cst_57 [1] : vector<16x16xf32> to vector<16xf32>
    %150 = vector.shape_cast %149 : vector<16xf32> to vector<16x1xf32>
    %151 = vector.broadcast %150 : vector<16x1xf32> to vector<16x16xf32>
    %152 = arith.subf %148, %151 : vector<16x16xf32>
    %153 = math.exp %152 : vector<16x16xf32>
    %cst_58 = arith.constant dense<0.000000e+00> : vector<16xf32>
    %154 = vector.multi_reduction <add>, %153, %cst_58 [1] : vector<16x16xf32> to vector<16xf32>
    %155 = vector.shape_cast %154 : vector<16xf32> to vector<16x1xf32>
    %156 = tpu.reciprocal %155 {approx = true} : vector<16x1xf32> -> vector<16x1xf32>
    %157 = vector.broadcast %156 : vector<16x1xf32> to vector<16x16xf32>
    %158 = arith.mulf %153, %157 : vector<16x16xf32>
    %159 = arith.truncf %144 : vector<8x16xf32> to vector<8x16xbf16>
    %160 = arith.truncf %158 : vector<16x16xf32> to vector<16x16xbf16>
    %cst_59 = arith.constant dense<0.000000e+00> : vector<8x16xf32>
    %161 = tpu.matmul %159, %160, %cst_59 {dimension_numbers = #tpu.dot_dimension_numbers<[1], [1], [0], [0], [0, 0, 1, 0], [], []>} : vector<8x16xbf16>, vector<16x16xbf16>, vector<8x16xf32> -> vector<8x16xf32>
    %162 = vector.extract_strided_slice %161 {offsets = [0, 0], sizes = [4, 16], strides = [1, 1]} : vector<8x16xf32> to vector<4x16xf32>
    %163 = vector.broadcast %0 : f32 to vector<4x16xf32>
    %164 = arith.mulf %163, %162 : vector<4x16xf32>
    %165 = arith.addf %164, %137 : vector<4x16xf32>
    %c0_60 = arith.constant 0 : index
    %c0_61 = arith.constant 0 : index
    %c4_62 = arith.constant 4 : index
    %c0_63 = arith.constant 0 : index
    %166 = vector.load %arg6[%c0_60, %c0_61, %c4_62, %c0_63] : memref<1x4x8x16xf32, #tpu.memory_space<vmem>>, vector<1x4x1x16xf32>
    %167 = vector.shape_cast %166 : vector<1x4x1x16xf32> to vector<4x16xf32>
    %168 = vector.shape_cast %165 : vector<4x16xf32> to vector<1x4x1x16xf32>
    tpu.vector_store %arg6[%c0_60, %c0_61, %c4_62, %c0_63], %168 {strides = array<i32>} : memref<1x4x8x16xf32, #tpu.memory_space<vmem>>, vector<1x4x1x16xf32>,
    %c0_64 = arith.constant 0 : index
    %c0_65 = arith.constant 0 : index
    %c5 = arith.constant 5 : index
    %c0_66 = arith.constant 0 : index
    %169 = vector.load %arg2[%c0_64, %c0_65, %c5, %c0_66] : memref<1x4x8x16xf32, #tpu.memory_space<vmem>>, vector<1x4x1x16xf32>
    %170 = vector.shape_cast %169 : vector<1x4x1x16xf32> to vector<4x16xf32>
    %171 = arith.truncf %170 : vector<4x16xf32> to vector<4x16xbf16>
    %cst_67 = arith.constant dense<0.000000e+00> : vector<24x16xf32>
    %172 = tpu.matmul %2, %171, %cst_67 {dimension_numbers = #tpu.dot_dimension_numbers<[1], [0], [0], [1], [0, 0, 1, 1], [], []>} : vector<24x4xbf16>, vector<4x16xbf16>, vector<24x16xf32> -> vector<24x16xf32>
    %173 = vector.broadcast %3 : vector<24x1xf32> to vector<24x16xf32>
    %174 = arith.addf %172, %173 : vector<24x16xf32>
    %175 = vector.extract_strided_slice %174 {offsets = [0, 0], sizes = [8, 16], strides = [1, 1]} : vector<24x16xf32> to vector<8x16xf32>
    %176 = vector.extract_strided_slice %174 {offsets = [8, 0], sizes = [8, 16], strides = [1, 1]} : vector<24x16xf32> to vector<8x16xf32>
    %177 = vector.extract_strided_slice %174 {offsets = [16, 0], sizes = [8, 16], strides = [1, 1]} : vector<24x16xf32> to vector<8x16xf32>
    %178 = tpu.transpose %175, [1, 0] : vector<8x16xf32> -> vector<16x8xf32>
    %179 = arith.truncf %178 : vector<16x8xf32> to vector<16x8xbf16>
    %180 = arith.truncf %176 : vector<8x16xf32> to vector<8x16xbf16>
    %cst_68 = arith.constant dense<0.000000e+00> : vector<16x16xf32>
    %181 = tpu.matmul %179, %180, %cst_68 {dimension_numbers = #tpu.dot_dimension_numbers<[1], [0], [0], [1], [0, 0, 1, 1], [], []>} : vector<16x8xbf16>, vector<8x16xbf16>, vector<16x16xf32> -> vector<16x16xf32>
    %cst_69 = arith.constant dense<0xFF800000> : vector<16xf32>
    %182 = vector.multi_reduction <maximumf>, %181, %cst_69 [1] : vector<16x16xf32> to vector<16xf32>
    %183 = vector.shape_cast %182 : vector<16xf32> to vector<16x1xf32>
    %184 = vector.broadcast %183 : vector<16x1xf32> to vector<16x16xf32>
    %185 = arith.subf %181, %184 : vector<16x16xf32>
    %186 = math.exp %185 : vector<16x16xf32>
    %cst_70 = arith.constant dense<0.000000e+00> : vector<16xf32>
    %187 = vector.multi_reduction <add>, %186, %cst_70 [1] : vector<16x16xf32> to vector<16xf32>
    %188 = vector.shape_cast %187 : vector<16xf32> to vector<16x1xf32>
    %189 = tpu.reciprocal %188 {approx = true} : vector<16x1xf32> -> vector<16x1xf32>
    %190 = vector.broadcast %189 : vector<16x1xf32> to vector<16x16xf32>
    %191 = arith.mulf %186, %190 : vector<16x16xf32>
    %192 = arith.truncf %177 : vector<8x16xf32> to vector<8x16xbf16>
    %193 = arith.truncf %191 : vector<16x16xf32> to vector<16x16xbf16>
    %cst_71 = arith.constant dense<0.000000e+00> : vector<8x16xf32>
    %194 = tpu.matmul %192, %193, %cst_71 {dimension_numbers = #tpu.dot_dimension_numbers<[1], [1], [0], [0], [0, 0, 1, 0], [], []>} : vector<8x16xbf16>, vector<16x16xbf16>, vector<8x16xf32> -> vector<8x16xf32>
    %195 = vector.extract_strided_slice %194 {offsets = [0, 0], sizes = [4, 16], strides = [1, 1]} : vector<8x16xf32> to vector<4x16xf32>
    %196 = vector.broadcast %0 : f32 to vector<4x16xf32>
    %197 = arith.mulf %196, %195 : vector<4x16xf32>
    %198 = arith.addf %197, %170 : vector<4x16xf32>
    %c0_72 = arith.constant 0 : index
    %c0_73 = arith.constant 0 : index
    %c5_74 = arith.constant 5 : index
    %c0_75 = arith.constant 0 : index
    %199 = vector.load %arg6[%c0_72, %c0_73, %c5_74, %c0_75] : memref<1x4x8x16xf32, #tpu.memory_space<vmem>>, vector<1x4x1x16xf32>
    %200 = vector.shape_cast %199 : vector<1x4x1x16xf32> to vector<4x16xf32>
    %201 = vector.shape_cast %198 : vector<4x16xf32> to vector<1x4x1x16xf32>
    tpu.vector_store %arg6[%c0_72, %c0_73, %c5_74, %c0_75], %201 {strides = array<i32>} : memref<1x4x8x16xf32, #tpu.memory_space<vmem>>, vector<1x4x1x16xf32>,
    %c0_76 = arith.constant 0 : index
    %c0_77 = arith.constant 0 : index
    %c6 = arith.constant 6 : index
    %c0_78 = arith.constant 0 : index
    %202 = vector.load %arg2[%c0_76, %c0_77, %c6, %c0_78] : memref<1x4x8x16xf32, #tpu.memory_space<vmem>>, vector<1x4x1x16xf32>
    %203 = vector.shape_cast %202 : vector<1x4x1x16xf32> to vector<4x16xf32>
    %204 = arith.truncf %203 : vector<4x16xf32> to vector<4x16xbf16>
    %cst_79 = arith.constant dense<0.000000e+00> : vector<24x16xf32>
    %205 = tpu.matmul %2, %204, %cst_79 {dimension_numbers = #tpu.dot_dimension_numbers<[1], [0], [0], [1], [0, 0, 1, 1], [], []>} : vector<24x4xbf16>, vector<4x16xbf16>, vector<24x16xf32> -> vector<24x16xf32>
    %206 = vector.broadcast %3 : vector<24x1xf32> to vector<24x16xf32>
    %207 = arith.addf %205, %206 : vector<24x16xf32>
    %208 = vector.extract_strided_slice %207 {offsets = [0, 0], sizes = [8, 16], strides = [1, 1]} : vector<24x16xf32> to vector<8x16xf32>
    %209 = vector.extract_strided_slice %207 {offsets = [8, 0], sizes = [8, 16], strides = [1, 1]} : vector<24x16xf32> to vector<8x16xf32>
    %210 = vector.extract_strided_slice %207 {offsets = [16, 0], sizes = [8, 16], strides = [1, 1]} : vector<24x16xf32> to vector<8x16xf32>
    %211 = tpu.transpose %208, [1, 0] : vector<8x16xf32> -> vector<16x8xf32>
    %212 = arith.truncf %211 : vector<16x8xf32> to vector<16x8xbf16>
    %213 = arith.truncf %209 : vector<8x16xf32> to vector<8x16xbf16>
    %cst_80 = arith.constant dense<0.000000e+00> : vector<16x16xf32>
    %214 = tpu.matmul %212, %213, %cst_80 {dimension_numbers = #tpu.dot_dimension_numbers<[1], [0], [0], [1], [0, 0, 1, 1], [], []>} : vector<16x8xbf16>, vector<8x16xbf16>, vector<16x16xf32> -> vector<16x16xf32>
    %cst_81 = arith.constant dense<0xFF800000> : vector<16xf32>
    %215 = vector.multi_reduction <maximumf>, %214, %cst_81 [1] : vector<16x16xf32> to vector<16xf32>
    %216 = vector.shape_cast %215 : vector<16xf32> to vector<16x1xf32>
    %217 = vector.broadcast %216 : vector<16x1xf32> to vector<16x16xf32>
    %218 = arith.subf %214, %217 : vector<16x16xf32>
    %219 = math.exp %218 : vector<16x16xf32>
    %cst_82 = arith.constant dense<0.000000e+00> : vector<16xf32>
    %220 = vector.multi_reduction <add>, %219, %cst_82 [1] : vector<16x16xf32> to vector<16xf32>
    %221 = vector.shape_cast %220 : vector<16xf32> to vector<16x1xf32>
    %222 = tpu.reciprocal %221 {approx = true} : vector<16x1xf32> -> vector<16x1xf32>
    %223 = vector.broadcast %222 : vector<16x1xf32> to vector<16x16xf32>
    %224 = arith.mulf %219, %223 : vector<16x16xf32>
    %225 = arith.truncf %210 : vector<8x16xf32> to vector<8x16xbf16>
    %226 = arith.truncf %224 : vector<16x16xf32> to vector<16x16xbf16>
    %cst_83 = arith.constant dense<0.000000e+00> : vector<8x16xf32>
    %227 = tpu.matmul %225, %226, %cst_83 {dimension_numbers = #tpu.dot_dimension_numbers<[1], [1], [0], [0], [0, 0, 1, 0], [], []>} : vector<8x16xbf16>, vector<16x16xbf16>, vector<8x16xf32> -> vector<8x16xf32>
    %228 = vector.extract_strided_slice %227 {offsets = [0, 0], sizes = [4, 16], strides = [1, 1]} : vector<8x16xf32> to vector<4x16xf32>
    %229 = vector.broadcast %0 : f32 to vector<4x16xf32>
    %230 = arith.mulf %229, %228 : vector<4x16xf32>
    %231 = arith.addf %230, %203 : vector<4x16xf32>
    %c0_84 = arith.constant 0 : index
    %c0_85 = arith.constant 0 : index
    %c6_86 = arith.constant 6 : index
    %c0_87 = arith.constant 0 : index
    %232 = vector.load %arg6[%c0_84, %c0_85, %c6_86, %c0_87] : memref<1x4x8x16xf32, #tpu.memory_space<vmem>>, vector<1x4x1x16xf32>
    %233 = vector.shape_cast %232 : vector<1x4x1x16xf32> to vector<4x16xf32>
    %234 = vector.shape_cast %231 : vector<4x16xf32> to vector<1x4x1x16xf32>
    tpu.vector_store %arg6[%c0_84, %c0_85, %c6_86, %c0_87], %234 {strides = array<i32>} : memref<1x4x8x16xf32, #tpu.memory_space<vmem>>, vector<1x4x1x16xf32>,
    %c0_88 = arith.constant 0 : index
    %c0_89 = arith.constant 0 : index
    %c7 = arith.constant 7 : index
    %c0_90 = arith.constant 0 : index
    %235 = vector.load %arg2[%c0_88, %c0_89, %c7, %c0_90] : memref<1x4x8x16xf32, #tpu.memory_space<vmem>>, vector<1x4x1x16xf32>
    %236 = vector.shape_cast %235 : vector<1x4x1x16xf32> to vector<4x16xf32>
    %237 = arith.truncf %236 : vector<4x16xf32> to vector<4x16xbf16>
    %cst_91 = arith.constant dense<0.000000e+00> : vector<24x16xf32>
    %238 = tpu.matmul %2, %237, %cst_91 {dimension_numbers = #tpu.dot_dimension_numbers<[1], [0], [0], [1], [0, 0, 1, 1], [], []>} : vector<24x4xbf16>, vector<4x16xbf16>, vector<24x16xf32> -> vector<24x16xf32>
    %239 = vector.broadcast %3 : vector<24x1xf32> to vector<24x16xf32>
    %240 = arith.addf %238, %239 : vector<24x16xf32>
    %241 = vector.extract_strided_slice %240 {offsets = [0, 0], sizes = [8, 16], strides = [1, 1]} : vector<24x16xf32> to vector<8x16xf32>
    %242 = vector.extract_strided_slice %240 {offsets = [8, 0], sizes = [8, 16], strides = [1, 1]} : vector<24x16xf32> to vector<8x16xf32>
    %243 = vector.extract_strided_slice %240 {offsets = [16, 0], sizes = [8, 16], strides = [1, 1]} : vector<24x16xf32> to vector<8x16xf32>
    %244 = tpu.transpose %241, [1, 0] : vector<8x16xf32> -> vector<16x8xf32>
    %245 = arith.truncf %244 : vector<16x8xf32> to vector<16x8xbf16>
    %246 = arith.truncf %242 : vector<8x16xf32> to vector<8x16xbf16>
    %cst_92 = arith.constant dense<0.000000e+00> : vector<16x16xf32>
    %247 = tpu.matmul %245, %246, %cst_92 {dimension_numbers = #tpu.dot_dimension_numbers<[1], [0], [0], [1], [0, 0, 1, 1], [], []>} : vector<16x8xbf16>, vector<8x16xbf16>, vector<16x16xf32> -> vector<16x16xf32>
    %cst_93 = arith.constant dense<0xFF800000> : vector<16xf32>
    %248 = vector.multi_reduction <maximumf>, %247, %cst_93 [1] : vector<16x16xf32> to vector<16xf32>
    %249 = vector.shape_cast %248 : vector<16xf32> to vector<16x1xf32>
    %250 = vector.broadcast %249 : vector<16x1xf32> to vector<16x16xf32>
    %251 = arith.subf %247, %250 : vector<16x16xf32>
    %252 = math.exp %251 : vector<16x16xf32>
    %cst_94 = arith.constant dense<0.000000e+00> : vector<16xf32>
    %253 = vector.multi_reduction <add>, %252, %cst_94 [1] : vector<16x16xf32> to vector<16xf32>
    %254 = vector.shape_cast %253 : vector<16xf32> to vector<16x1xf32>
    %255 = tpu.reciprocal %254 {approx = true} : vector<16x1xf32> -> vector<16x1xf32>
    %256 = vector.broadcast %255 : vector<16x1xf32> to vector<16x16xf32>
    %257 = arith.mulf %252, %256 : vector<16x16xf32>
    %258 = arith.truncf %243 : vector<8x16xf32> to vector<8x16xbf16>
    %259 = arith.truncf %257 : vector<16x16xf32> to vector<16x16xbf16>
    %cst_95 = arith.constant dense<0.000000e+00> : vector<8x16xf32>
    %260 = tpu.matmul %258, %259, %cst_95 {dimension_numbers = #tpu.dot_dimension_numbers<[1], [1], [0], [0], [0, 0, 1, 0], [], []>} : vector<8x16xbf16>, vector<16x16xbf16>, vector<8x16xf32> -> vector<8x16xf32>
    %261 = vector.extract_strided_slice %260 {offsets = [0, 0], sizes = [4, 16], strides = [1, 1]} : vector<8x16xf32> to vector<4x16xf32>
    %262 = vector.broadcast %0 : f32 to vector<4x16xf32>
    %263 = arith.mulf %262, %261 : vector<4x16xf32>
    %264 = arith.addf %263, %236 : vector<4x16xf32>
    %c0_96 = arith.constant 0 : index
    %c0_97 = arith.constant 0 : index
    %c7_98 = arith.constant 7 : index
    %c0_99 = arith.constant 0 : index
    %265 = vector.load %arg6[%c0_96, %c0_97, %c7_98, %c0_99] : memref<1x4x8x16xf32, #tpu.memory_space<vmem>>, vector<1x4x1x16xf32>
    %266 = vector.shape_cast %265 : vector<1x4x1x16xf32> to vector<4x16xf32>
    %267 = vector.shape_cast %264 : vector<4x16xf32> to vector<1x4x1x16xf32>
    tpu.vector_store %arg6[%c0_96, %c0_97, %c7_98, %c0_99], %267 {strides = array<i32>} : memref<1x4x8x16xf32, #tpu.memory_space<vmem>>, vector<1x4x1x16xf32>,
    return
  }
  func.func @transform_0(%arg0: i32, %arg1: i32) -> (i32, i32, i32, i32) {
    %c0_i32 = arith.constant 0 : i32
    %c0_i32_0 = arith.constant 0 : i32
    %c0_i32_1 = arith.constant 0 : i32
    return %arg0, %c0_i32, %arg1, %c0_i32_0 : i32, i32, i32, i32
  }
  func.func @transform_1(%arg0: i32, %arg1: i32) -> (i32, i32) {
    %c0_i32 = arith.constant 0 : i32
    %c0_i32_0 = arith.constant 0 : i32
    %c0_i32_1 = arith.constant 0 : i32
    return %c0_i32, %c0_i32_0 : i32, i32
  }
  func.func @transform_2(%arg0: i32, %arg1: i32) -> (i32, i32) {
    %c0_i32 = arith.constant 0 : i32
    %c0_i32_0 = arith.constant 0 : i32
    %c0_i32_1 = arith.constant 0 : i32
    return %c0_i32, %c0_i32_0 : i32, i32
  }
  func.func @transform_3(%arg0: i32, %arg1: i32) -> i32 {
    %c0_i32 = arith.constant 0 : i32
    %c0_i32_0 = arith.constant 0 : i32
    return %c0_i32 : i32
  }
  func.func @transform_4(%arg0: i32, %arg1: i32) -> (i32, i32, i32, i32) {
    %c0_i32 = arith.constant 0 : i32
    %c0_i32_0 = arith.constant 0 : i32
    %c0_i32_1 = arith.constant 0 : i32
    return %arg0, %c0_i32, %arg1, %c0_i32_0 : i32, i32, i32, i32
  }
}

</mosaic_0001>

<bundles_post_ra>
// kernel: tpu_custom_call.1
= control target key start
LH: loop header
LB: loop body
LE: loop exit
PB: predicated region body
PF: predicated region fallthrough
CT: control target
= control target key end

     0   :  { %s3871_s0 = inlined_call_operand.hbm [shape: f32[2,4,16,16], index: 0, kind: input, shape index: {}]   ;;  %s3872_s1 = inlined_call_operand.vmem [shape: f32[24,4], index: 1, kind: input, shape index: {}]   ;;  %s3873_s2 = inlined_call_operand.vmem [shape: f32[24,1], index: 2, kind: input, shape index: {}]   ;;  %s3874_s3 = inlined_call_operand.<no memory space> [shape: f32[1], index: 3, kind: input, shape index: {}]   ;;  %s3875_s4 = inlined_call_operand.hbm [shape: f32[2,4,16,16], index: 4, kind: output, shape index: {}]  }
   0x1   :  { %9 = sst [smem:[#allocation2]] %s3874_s3 }
   0x2   :  { %10 = vsyncpa [#allocation4], 0 }
   0x3   :  { %12 = vsyncpa [#allocation4 + $0x1], 0 }
   0x4   :  { %13 = vsyncpa [#allocation5], 0 }
   0x5   :  { %15 = vsyncpa [#allocation5 + $0x1], 0  ;;  %s3120_s17 = smov 0   ;;  %s3122_s18 = smov 0  }
   0x6   :  { %s3124_s19 = smov 0   ;;  %s3126_s20 = smov 0  }
   0x7   :  { %s3128_s21 = smov 0   ;;  %s3130_s22 = smov 0  }
   0x8   :  { %s3132_s23 = smov 0   ;;  %s3134_s24 = smov 0  }
   0x9 LB: > { %s2546_s3 = sadd.s32 4294967295, %s3078_s24   ;;  %s2547_s25 = sadd.s32 4294967294, %s3078_s24   ;;  %s3078_s24 = sphi %s3134_s24, %s21_s24   ;;  %s3074_s23 = sphi %s3132_s23, %s3893_s23   ;;  %s3070_s22 = sphi %s3130_s22, %s3892_s22   ;;  %s3066_s21 = sphi %s3128_s21, %s3891_s21   ;;  %s3062_s20 = sphi %s3126_s20, %s3890_s20   ;;  %s3058_s19 = sphi %s3124_s19, %s3889_s19   ;;  %s3054_s18 = sphi %s3122_s18, %s3888_s18   ;;  %s3050_s17 = sphi %s3120_s17, %s3887_s17  }
   0xa   : > { %s30_s26 = sadd.s32 1, %s3070_s22  ;;  %s33_s27 = sadd.s32 1, %s3074_s23 }
   0xb   : > { %p31_p0 = scmp.ge.s32.totalorder %s30_s26, 2  ;;  %s42_s28 = sadd.s32 1, %s3058_s19 }
   0xc   : > { %p49_p1 = scmp.ne.s32.totalorder %s3058_s19, %s3054_s18  ;;  %p50_p2 = scmp.eq.s32.totalorder %s3078_s24, 0 }
   0xd   : > { %s3895_s26 = smov (%p31_p0, %s30_s26), 0  ;;  %s3897_s27 = smov (!%p31_p0, %s33_s27), %s3074_s23 }
   0xe   : > { %3878 = sst [smem:[#allocation9_spill]] %s3895_s26  ;;  %s38_s29 = ssub.s32 %s3070_s22, %s3895_s26 }
   0xf   : > { %p3173_p3 = por %p50_p2, %p49_p1  ;;  %p35_p4 = scmp.ge.s32.totalorder %s3897_s27, 2 }
  0x10   : > { %p55_p5 = scmp.ne.s32.totalorder %s3054_s18, %s3050_s17  ;;  %p56_p6 = scmp.eq.s32.totalorder %s2546_s3, 0 }
  0x11   : > { %p144_p7 = scmp.eq.s32.totalorder %s2546_s3, 3  ;;  %s3899_s27 = smov (%p35_p4, %s3897_s27), 0 }
  0x12   : > { %3880 = sst [smem:[#allocation10_spill]] %s3899_s27  ;;  %p3181_p8 = por %p56_p6, %p55_p5 }
  0x13   : > { %p3185_p9 = por %p144_p7, %p49_p1  ;;  %s37_s7 = ssub.s32 %s3074_s23, %s3899_s27 }
  0x14   : > { %p150_p10 = scmp.eq.s32.totalorder %s2547_s25, 3  ;;  %s39_s8 = sor.u32 %s38_s29, %s37_s7 }
  0x15   : > { %p40_p11 = scmp.eq.s32.totalorder %s39_s8, 0  ;;  %p2813_p13 = scmp.lt.s32.totalorder %s3078_s24, 4 }
  0x16   : > { %p3191_p12 = por %p150_p10, %p55_p5  ;;  %s179_s10 = sand.u32 1, %s3058_s19  }
  0x17   : > { %s3198_s11 = scalar_select %p40_p11, %s3058_s19, %s42_s28  }
  0x18   : > { %s2550_s12 = sshll.u32 %s179_s10, 5  ;;  %s2551_s13 = sshll.u32 %s3074_s23, 3 }
  0x19   : > { %s188_s14 = sadd.s32 %s3070_s22, %s2551_s13  ;;  %s183_s15 = scalar_lea.vmem [#allocation3], %s2550_s12 }
  0x1a   : > { %s191_s16 = sshll.u32 %s183_s15, 4  ;;  %s2552_s3 = sshll.u32 %s188_s14, 7  ;;  %s192_s16 = int_to_ptr.vmem [resolvable:$true] %s191_s16 }
  0x1b   : > { %s190_s25 = scalar_lea.hbm %s3871_s0, %s2552_s3  ;;  %p3207_p0 = pnand %p2813_p13, %p3173_p3 }
  0x1c   : > { %s180_s7 = scalar_lea.sflag [#allocation4], %s179_s10  ;;  %s2967_s28 = scalar_lea.vmem %s192_s16, 512 }
  0x1d   : > { %p2956_p1 = pneg %p3207_p0  ;;  %p2968_p2 = scmp.ne.s32.totalorder %s192_s16, %s2967_s28 }
  0x1e   : > { %s3080_s8 = smov [#allocation3]  }
  0x1f   : > { %p2970_p4 = pnand %p2968_p2, %p2956_p1  ;;  %s2972_s12 = sshll.u32 %s3080_s8, 4  ;;  %s2973_s12 = int_to_ptr.vmem [resolvable:$false] %s2972_s12 }
  0x20   : > { %s2974_s13 = scalar_lea.vmem %s2973_s12, 1024  ;;  %p2975_p6 = scmp.lt.s32.totalorder %s192_s16, %s2973_s12 }
  0x21   : > { %p2971_p5 = pneg %p2970_p4  ;;  %p2976_p7 = scmp.lt.s32.totalorder %s2974_s13, %s2967_s28 }
  0x23   : > { %p2977_p10 = por %p2976_p7, %p2975_p6 }
  0x25   : > { %p2978_p11 = pnand %p2977_p10, %p2971_p5 }
  0x27   : > { %2981 = shalt.err (!%p2978_p11)
}
  0x28   : > { %s3081_s26 = smov 256   ;;  %s3082_s27 = smov 128  }
  0x29   : > { %s3083_s30 = smov 8   ;;  %p2553_p3 = scmp.ge.s32.totalorder %s3078_s24, 1 }
  0x2a   : > { %2808 = dma.hbm_to_vmem [thread:$0]  (!%p3207_p0), %s190_s25, 512, %s192_s16, %s180_s7, %s3081_s26, %s3082_s27, %s3083_s30  }
  0x2b   : > { %p199_p13 = scmp.lt.s32.totalorder %s3078_s24, 5 }
  0x2d   : > { %p200_p1 = pnand %p2553_p3, %p199_p13 }
  0x2e   : > { %s3218_s10 = sand.u32 (!%p200_p1), 1, %s3054_s18  }
  0x2f   : > { %203 = sbr.rel (%p200_p1) target bundleno = 4855 (0x12f7), region = 36  ;;  %s2554_s14 = sshll.u32 (!%p200_p1), %s3218_s10, 5 }
  0x30   : > { %s206_s15 = scalar_lea.sflag (!%p200_p1), [#allocation4], %s3218_s10  ;;  %s3224_s3 = scalar_lea.vmem (!%p200_p1), [#allocation3], %s2554_s14 }
  0x34   : > { %3041 = dma.done.wait (%p3181_p8), %s206_s15, 512  }
  0x35   : > { %3043 = vsyncadd (%p3181_p8), %s206_s15, 4294966784  ;;  %v3084_v0 = vmov 0   ;;  %v3231_v1 = vld [vmem:[%s3224_s3] sm:$0x1]  ;;  %v3234_v2 = vld [vmem:[%s3224_s3 + $0x8] sm:$0x1] }
  0x36   : > { %2889 = vset.pattern.permute.xlu0 %v3084_v0  ;;  %v3237_v3 = vld [vmem:[%s3224_s3 + $0x10] sm:$0x1]  ;;  %v3240_v4 = vld [vmem:[%s3224_s3 + $0x18] sm:$0x1]  ;;  %v248_v5 = vpack.c.bf16 %v3231_v1, %v3231_v1  ;;  %v249_v6 = vpack.c.bf16 %v3234_v2, %v3234_v2  ;;  %v236_v8 = vld [vmem:[%s3872_s1] sm:$0xff]  ;;  %vm285_vm0 = vcmask 31744  }
  0x37   : > { %v250_v7 = vpack.c.bf16 %v3237_v3, %v3237_v3  ;;  %v237_v9 = vld [vmem:[%s3872_s1 + $0x8] sm:$0xff]  ;;  %v251_v10 = vpack.c.bf16 %v3240_v4, %v3240_v4  ;;  %v241_v12 = vld [vmem:[%s3873_s2] sm:$0xff]  ;;  %vm276_vm1 = vcmask 1041409   ;;  %vm279_vm2 = vcmask 1042434   ;;  %v238_v24 = vld [vmem:[%s3872_s1 + $0x10] sm:$0xff]  ;;  %s235_s15 = sld [smem:[#allocation2]] }
  0x38   : > { %v3256_v11 = vpack.c.bf16 %v237_v9, %v236_v8  ;;  %v271_v13 = vunpack.c.l.b16 %v248_v5  ;;  %v272_v14 = vunpack.c.l.b16 %v249_v6  ;;  %254 = vperm.xlu0 %2889, %v241_v12   ;;  %v242_v17 = vld [vmem:[%s3873_s2 + $0x8] sm:$0xff]  ;;  %vm282_vm3 = vcmask 1043459   ;;  %v3288_v32 = vld [vmem:[%s3224_s3 + $0x11] sm:$0x1]  ;;  %v3293_v35 = vld [vmem:[%s3224_s3 + $0x1] sm:$0x1] }
  0x39   : > { %v273_v15 = vunpack.c.l.b16 %v250_v7  ;;  %v274_v16 = vunpack.c.l.b16 %v251_v10  ;;  %vm292_vm4 = vcmask 1041408   ;;  %v3274_v27 = vpack.c.bf16 %v238_v24, %v238_v24  ;;  %v3285_v31 = vld [vmem:[%s3224_s3 + $0x9] sm:$0x1]  ;;  %v3296_v36 = vld [vmem:[%s3224_s3 + $0x19] sm:$0x1]  ;;  %s3397_s5 = scalar_lea.vmem [#allocation6], %s2554_s14 }
  0x3a   : > { %2651 = vmatprep.mubr.msk.bf16.mxu0 %vm285_vm0, %v3256_v11  ;;  %v275_v18 = vrot.slane %v272_v14, 7  ;;  %v3085_v28 = vmov 0.0   ;;  %v551_v33 = vpack.c.bf16 %v3285_v31, %v3285_v31  ;;  %v552_v37 = vpack.c.bf16 %v3288_v32, %v3288_v32  ;;  %s2589_s14 = sshll.u32 %s3066_s21, 3  ;;  %s2458_s25 = sshll.u32 %s3397_s5, 4  ;;  %s3812_s25 = int_to_ptr.vmem [resolvable:$true] %s2458_s25 }
  0x3b   : > { %v278_v19 = vrot.slane %v273_v15, 6  ;;  %v281_v20 = vrot.slane %v274_v16, 5  ;;  %2655 = vmatprep.subr.bf16.mxu1 %v3085_v28  ;;  %v550_v39 = vpack.c.bf16 %v3293_v35, %v3293_v35  ;;  %v553_v40 = vpack.c.bf16 %v3296_v36, %v3296_v36  ;;  %s2444_s7 = scalar_lea.sflag [#allocation5], %s3218_s10  ;;  %s2982_s28 = scalar_lea.vmem %s3812_s25, 512 }
  0x3c   : > { %v277_v21 = vsel %vm276_vm1, %v275_v18, %v271_v13  ;;  %259 = vperm.xlu0 %2889, %v242_v17   ;;  %v559_v41 = vunpack.c.l.b16 %v551_v33  ;;  %v560_v43 = vunpack.c.l.b16 %v552_v37  ;;  %vm3086_vm5 = vmmov 0   ;;  %v3340_v33 = vld [vmem:[%s3224_s3 + $0x12] sm:$0x1]  ;;  %v3345_v37 = vld [vmem:[%s3224_s3 + $0x2] sm:$0x1]  ;;  %p2983_p8 = scmp.ne.s32.totalorder %s3812_s25, %s2982_s28  ;;  %s3088_s8 = smov [#allocation6]  }
  0x3d   : > { %v280_v22 = vsel %vm279_vm2, %v278_v19, %v277_v21  ;;  %v558_v44 = vunpack.c.l.b16 %v550_v39  ;;  %v561_v45 = vunpack.c.l.b16 %v553_v40  ;;  %2657 = vmatprep.mubr.msk.bf16.mxu1 %vm3086_vm5, %v3085_v28  ;;  %vm382_vm6 = vcmask 1043456   ;;  %s2986_s12 = sshll.u32 %s3088_s8, 4  ;;  %s2987_s12 = int_to_ptr.vmem [resolvable:$false] %s2986_s12 }
  0x3e   : > { %v283_v23 = vsel %vm282_vm3, %v281_v20, %v280_v22  ;;  %v562_v46 = vrot.slane %v559_v41, 7  ;;  %v564_v49 = vrot.slane %v560_v43, 6  ;;  %vm378_vm7 = vcmask 64512   ;;  %p2984_p0 = pnand %p2983_p8, %p3185_p9  ;;  %s2988_s13 = scalar_lea.vmem %s2987_s12, 1024 }
  0x3f   : > { %v284_v25 = vpack.c.b16 %v283_v23, %v283_v23  ;;  %v566_v52 = vrot.slane %v561_v45, 5  ;;  %vm427_vm8 = vcmask 130048   ;;  %v243_v23 = vld [vmem:[%s3873_s2 + $0x10] sm:$0xff]  ;;  %v823_v39 = vpack.c.bf16 %v3340_v33, %v3340_v33  ;;  %p2989_p4 = scmp.lt.s32.totalorder %s3812_s25, %s2987_s12  ;;  %p2990_p5 = scmp.lt.s32.totalorder %s2988_s13, %s2982_s28 }
  0x40   : > { %v563_v51 = vsel %vm276_vm1, %v562_v46, %v558_v44  ;;  %v821_v40 = vpack.c.bf16 %v3345_v37, %v3345_v37  ;;  %vm541_vm9 = vcmask 122880   ;;  %p2985_p2 = pneg %p2984_p0 }
  0x41   : > { %2793 = vmatprep.subr.msk.bf16.mxu0 %vm292_vm4, %v284_v25  ;;  %v294_v26 = vsel %vm292_vm4, %v284_v25, 0  ;;  %v565_v53 = vsel %vm279_vm2, %v564_v49, %v563_v51  ;;  %v831_v43 = vunpack.c.l.b16 %v823_v39  ;;  %p2991_p6 = por %p2990_p5, %p2989_p4 }
  0x42   : > { %2650 = vmatpush3.bf16.msra.mxu0 %v294_v26  ;;  %v567_v55 = vsel %vm282_vm3, %v566_v52, %v565_v53  ;;  %v3337_v26 = vld [vmem:[%s3224_s3 + $0xa] sm:$0x1]  ;;  %v829_v45 = vunpack.c.l.b16 %v821_v40 }
  0x43   : > { %2661 = vmatprep.subr.bf16.mxu0 %v3085_v28  ;;  %v568_v56 = vpack.c.b16 %v567_v55, %v567_v55  ;;  %v835_v52 = vrot.slane %v831_v43, 6  ;;  %p2992_p7 = pnand %p2991_p6, %p2985_p2 }
  0x45   : > { %2652 = vmatmul.mubr.msk.bf16.vlgmr.msra.gmra.mxu0 %vm285_vm0, %v3274_v27  ;;  %v570_v61 = vsel %vm292_vm4, %v568_v56, 0 }
  0x46   : > { %2663 = vmatprep.mubr.msk.bf16.mxu0 %vm3086_vm5, %v3085_v28 }
  0xb3   : > { %v3280_v29 = vpop.permute.xlu0 %254 }
  0xb7   : > { %v3305_v47 = vpop.permute.xlu0 %259 }
 0x105   : > { %v3282_v30 = vpop.f32.mrf.mxu0 }
 0x107   : > { %v330_v34 = vpop.f32.mrf.mxu0 }
 0x108   : > { %v331_v38 = vadd.f32 %v330_v34, %v3280_v29  ;;  %v822_v34 = vpack.c.bf16 %v3337_v26, %v3337_v26 }
 0x109   : > { %v2654_v42 = vpop.f32.mrf.mxu0 }
 0x10a   : > { %344 = vxpose.xlu1.b32.start.end [1/1] (short) (narrow) %v331_v38, 16  ;;  %v3348_v38 = vld [vmem:[%s3224_s3 + $0x1a] sm:$0x1]  ;;  %v830_v41 = vunpack.c.l.b16 %v822_v34 }
 0x10b   : > { %v333_v48 = vpop.f32.mrf.mxu0  ;;  %v824_v42 = vpack.c.bf16 %v3348_v38, %v3348_v38 }
 0x10c   : > { %v334_v50 = vadd.f32 %v333_v48, %v3305_v47  ;;  %v833_v46 = vrot.slane %v830_v41, 7 }
 0x10d   : > { %v832_v49 = vunpack.c.l.b16 %v824_v42 }
 0x10e   : > { %v377_v54 = vpack.c.bf16 %v334_v50, %v334_v50 }
 0x110   : > { %v384_v57 = vsel %vm382_vm6, %v377_v54, 0  ;;  %v834_v54 = vsel %vm276_vm1, %v833_v46, %v829_v45 }
 0x111   : > { %2656 = vmatpush3.bf16.msra.mxu1 %v384_v57  ;;  %v837_v57 = vrot.slane %v832_v49, 5 }
 0x112   : > { %2794 = vmatprep.subr.msk.bf16.mxu1 %vm292_vm4, %v568_v56 }
 0x186   : > { %v360_v58 = vpop.trf.xlu1 }
 0x18a   : > { %v361_v59 = vpop.trf.xlu1 }
 0x18b   : > { %v376_v60 = vpack.c.bf16 %v361_v59, %v360_v58 }
 0x18d   : > { %2658 = vmatmul.mubr.msk.bf16.vlgmr.msra.gmra.mxu1 %vm378_vm7, %v376_v60  ;;  %v836_v60 = vsel %vm279_vm2, %v835_v52, %v834_v54 }
 0x18e   : > { %2668 = vmatpush3.bf16.msra.mxu1 %v570_v61  ;;  %2669 = vmatprep.mubr.msk.bf16.mxu1 %vm285_vm0, %v3256_v11 }
 0x18f   : > { %2679 = vmatprep.subr.bf16.mxu1 %v3085_v28 }
 0x195   : > { %2670 = vmatmul.mubr.msk.bf16.vlgmr.msra.gmra.mxu1 %vm285_vm0, %v3274_v27 }
 0x196   : > { %2681 = vmatprep.mubr.msk.bf16.mxu1 %vm3086_vm5, %v3085_v28 }
 0x24d   : > { %v420_v62 = vpop.f32.mrf.mxu1 }
 0x24e   : > { %v428_v63 = vsel %vm427_vm8, %v420_v62, -inf }
 0x24f   : > { %429 = vmax.xlane.f32.xlu1 %v428_v63  ;;  %v2659_v0 = vpop.f32.mrf.mxu1 }
 0x251   : > { %v423_v5 = vpop.f32.mrf.mxu1 }
 0x252   : > { %v431_v6 = vsel %vm427_vm8, %v423_v5, -inf }
 0x253   : > { %432 = vmax.xlane.f32.xlu0 %v431_v6  ;;  %v2660_v7 = vpop.f32.mrf.mxu1 }
 0x255   : > { %v3328_v8 = vpop.f32.mrf.mxu1 }
 0x257   : > { %v606_v9 = vpop.f32.mrf.mxu1 }
 0x258   : > { %v607_v12 = vadd.f32 %v606_v9, %v3280_v29 }
 0x259   : > { %v2672_v10 = vpop.f32.mrf.mxu1 }
 0x25b   : > { %v609_v53 = vpop.f32.mrf.mxu1 }
 0x25c   : > { %v610_v58 = vadd.f32 %v609_v53, %v3305_v47 }
 0x25e   : > { %v653_v63 = vpack.c.bf16 %v610_v58, %v610_v58 }
 0x260   : > { %v658_v7 = vsel %vm382_vm6, %v653_v63, 0 }
 0x282   : > { %620 = vxpose.xlu1.b32.start.end [1/1] (short) (narrow) %v607_v12, 16  ;;  %v504_v12 = vrot.slane %v3234_v2, 7 }
 0x2d8   : > { %v430_v13 = vpop.xlane.xlu1 %429 }
 0x2d9   : > { %v434_v14 = vsub.f32 %v420_v62, %v430_v13  ;;  %v838_v62 = vsel %vm282_vm3, %v837_v57, %v836_v60  ;;  %v506_v13 = vrot.slane %v3237_v3, 6 }
 0x2da   : > { %v839_v6 = vpack.c.b16 %v838_v62, %v838_v62 }
 0x2db   : > { %v436_v15 = vmul.f32 1.442695, %v434_v14  ;;  %v3087_v14 = vmov 1966171168  }
 0x2dc   : > { %v433_v16 = vpop.xlane.xlu0 %432  ;;  %v841_v10 = vsel %vm292_vm4, %v839_v6, 0 }
 0x2dd   : > { %2890 = vpow2.f32 %v436_v15  ;;  %v435_v17 = vsub.f32 %v423_v5, %v433_v16  ;;  %v514_v15 = vunpack.c.l.s4 %v3087_v14  ;;  %v516_v16 = vlaneseq  ;;  %v3426_v14 = vld [vmem:[%s3224_s3 + $0x1b] sm:$0x1] }
 0x2df   : > { %v438_v18 = vmul.f32 1.442695, %v435_v17  ;;  %v505_v17 = vsel %vm276_vm1, %v504_v12, %v3231_v1 }
 0x2e1   : > { %2892 = vpow2.f32 %v438_v18  ;;  %v508_v18 = vrot.slane %v3240_v4, 5 }
 0x2ea   : > { %v2891_v19 = vpop.eup %2890 }
 0x2eb   : > { %v440_v20 = vsel %vm427_vm8, %v2891_v19, 0.0 }
 0x2ec   : > { %441 = vadd.xlane.f32.xlu0 %v440_v20  ;;  %v515_v20 = vunpack.c.0.s8 %v514_v15 }
 0x2ee   : > { %v2893_v21 = vpop.eup %2892 }
 0x2ef   : > { %v443_v22 = vsel %vm427_vm8, %v2893_v21, 0.0 }
 0x2f0   : > { %444 = vadd.xlane.f32.xlu0 %v443_v22  ;;  %v3386_v22 = vstv %s235_s15 }
 0x2fe   : > { %v636_v0 = vpop.trf.xlu1 }
 0x302   : > { %v637_v9 = vpop.trf.xlu1 }
 0x306   : > { %264 = vperm.xlu0 %2889, %v243_v23  }
 0x375   : > { %v442_v24 = vpop.xlane.xlu0 %441 }
 0x376   : > { %2894 = vrcp.f32 %v442_v24 }
 0x379   : > { %v445_v25 = vpop.xlane.xlu0 %444 }
 0x37a   : > { %2896 = vrcp.f32 %v445_v25 }
 0x381   : > { %v3357_v56 = vpop.permute.xlu0 %264 }
 0x382   : > { %v339_v61 = vadd.f32 %v3282_v30, %v3357_v56  ;;  %v652_v30 = vpack.c.bf16 %v637_v9, %v636_v0 }
 0x383   : > { %v2895_v44 = vpop.eup %2894 }
 0x384   : > { %v448_v50 = vmul.f32 %v2895_v44, %v2891_v19  ;;  %v450_v5 = vpack.c.bf16 %v339_v61, %v339_v61  ;;  %v507_v19 = vsel %vm279_vm2, %v506_v13, %v505_v17  ;;  %v3423_v13 = vld [vmem:[%s3224_s3 + $0x3] sm:$0x1] }
 0x385   : > { %v509_v2 = vsel %vm282_vm3, %v508_v18, %v507_v19  ;;  %v1095_v18 = vpack.c.bf16 %v3426_v14, %v3426_v14 }
 0x387   : > { %v2897_v48 = vpop.eup %2896 }
 0x388   : > { %v449_v51 = vmul.f32 %v2897_v48, %v2893_v21  ;;  %v517_v21 = vshrl.u32 %v516_v16, 7  ;;  %v1092_v16 = vpack.c.bf16 %v3423_v13, %v3423_v13 }
 0x38a   : > { %v451_v55 = vpack.c.bf16 %v449_v51, %v448_v50  ;;  %v3390_v24 = vsub.s32 %v515_v20, %v517_v21  ;;  %v1100_v21 = vunpack.c.l.b16 %v1092_v16 }
 0x38c   : > { %v456_v59 = vsel %vm427_vm8, %v451_v55, 0 }
 0x38d   : > { %2662 = vmatpush3.bf16.xpose.msra.mxu0 %v456_v59 }
 0x38e   : > { %2673 = vmatprep.subr.bf16.mxu0 %v3085_v28 }
 0x394   : > { %2664 = vmatmul.mubr.msk.bf16.vlgmr.msra.gmra.mxu0 %vm427_vm8, %v450_v5 }
 0x395   : > { %2674 = vmatpush3.bf16.msra.mxu0 %v658_v7  ;;  %2675 = vmatprep.mubr.msk.bf16.mxu0 %vm3086_vm5, %v3085_v28 }
 0x396   : > { %2795 = vmatprep.subr.msk.bf16.mxu0 %vm292_vm4, %v839_v6 }
 0x39c   : > { %2676 = vmatmul.mubr.msk.bf16.vlgmr.msra.gmra.mxu0 %vm378_vm7, %v652_v30  ;;  %v3415_v30 = vld [vmem:[%s3224_s3 + $0xb] sm:$0x1] }
 0x39d   : > { %2686 = vmatpush3.bf16.msra.mxu0 %v841_v10  ;;  %2687 = vmatprep.mubr.msk.bf16.mxu0 %vm285_vm0, %v3256_v11  ;;  %v3418_v10 = vld [vmem:[%s3224_s3 + $0x13] sm:$0x1]  ;;  %v1093_v12 = vpack.c.bf16 %v3415_v30, %v3415_v30 }
 0x39e   : > { %2697 = vmatprep.subr.bf16.mxu0 %v3085_v28  ;;  %v1094_v15 = vpack.c.bf16 %v3418_v10, %v3418_v10 }
 0x39f   : > { %v1101_v17 = vunpack.c.l.b16 %v1093_v12 }
 0x3a0   : > { %v1102_v19 = vunpack.c.l.b16 %v1094_v15 }
 0x3a4   : > { %2688 = vmatmul.mubr.msk.bf16.vlgmr.msra.gmra.mxu0 %vm285_vm0, %v3274_v27 }
 0x3a5   : > { %2699 = vmatprep.mubr.msk.bf16.mxu0 %vm3086_vm5, %v3085_v28 }
 0x454   : > { %v492_v23 = vpop.f32.mrf.mxu0 }
 0x455   : > { %v499_v3 = vmul.f32 %v3386_v22, %v492_v23  ;;  %v1104_v23 = vrot.slane %v1101_v17, 7 }
 0x456   : > { %v2665_v25 = vpop.f32.mrf.mxu0 }
 0x457   : > { %v511_v34 = vadd.f32 %v509_v2, %v499_v3  ;;  %v1103_v3 = vunpack.c.l.b16 %v1095_v18 }
 0x458   : > { %v495_v39 = vpop.f32.mrf.mxu0 }
 0x459   : > { %v519_v1 = vrot.slane %v511_v34, %v3390_v24  ;;  %v1106_v39 = vrot.slane %v1102_v19, 6 }
 0x45a   : > { %v2666_v4 = vpop.f32.mrf.mxu0 }
 0x45b   : > { %v520_v40 = vcombine.high %v519_v1, %v519_v1  ;;  %v527_v41 = vrot.slane %v519_v1, %v3390_v24  ;;  %v1105_v4 = vsel %vm276_vm1, %v1104_v23, %v1100_v21 }
 0x45c   : > { %v694_v42 = vpop.f32.mrf.mxu0 }
 0x45d   : > { %v534_v43 = vrot.slane %v520_v40, %v3390_v24  ;;  %v535_v44 = vcombine.high %v527_v41, %v527_v41  ;;  %542 = vst.msk [vmem:[%s3397_s5] sm:$0x1] %vm541_vm9, %v527_v41  ;;  %v701_v45 = vsel %vm427_vm8, %v694_v42, -inf  ;;  %v1108_v41 = vrot.slane %v1103_v3, 5 }
 0x45e   : > { %702 = vmax.xlane.f32.xlu0 %v701_v45  ;;  %v2677_v46 = vpop.f32.mrf.mxu0  ;;  %v615_v45 = vadd.f32 %v3328_v8, %v3357_v56 }
 0x45f   : > { %v536_v48 = vcombine.high %v534_v43, %v534_v43  ;;  %543 = vst.msk [vmem:[%s3397_s5 + $0x8] sm:$0x1] %vm541_vm9, %v534_v43  ;;  %544 = vst.msk [vmem:[%s3397_s5 + $0x10] sm:$0x1] %vm541_vm9, %v535_v44  ;;  %v1107_v44 = vsel %vm279_vm2, %v1106_v39, %v1105_v4 }
 0x460   : > { %v697_v49 = vpop.f32.mrf.mxu0  ;;  %v1109_v46 = vsel %vm282_vm3, %v1108_v41, %v1107_v44 }
 0x461   : > { %545 = vst.msk [vmem:[%s3397_s5 + $0x18] sm:$0x1] %vm541_vm9, %v536_v48  ;;  %v704_v50 = vsel %vm427_vm8, %v697_v49, -inf }
 0x462   : > { %705 = vmax.xlane.f32.xlu1 %v704_v50  ;;  %v2678_v51 = vpop.f32.mrf.mxu0  ;;  %v1110_v50 = vpack.c.b16 %v1109_v46, %v1109_v46 }
 0x464   : > { %v3409_v52 = vpop.f32.mrf.mxu0 }
 0x466   : > { %v877_v53 = vpop.f32.mrf.mxu0 }
 0x467   : > { %v878_v6 = vadd.f32 %v877_v53, %v3280_v29 }
 0x468   : > { %v2690_v54 = vpop.f32.mrf.mxu0 }
 0x46a   : > { %v880_v1 = vpop.f32.mrf.mxu0 }
 0x4e7   : > { %v703_v55 = vpop.xlane.xlu0 %702 }
 0x4e8   : > { %v707_v57 = vsub.f32 %v694_v42, %v703_v55  ;;  %v881_v42 = vadd.f32 %v880_v1, %v3305_v47  ;;  %v1112_v55 = vsel %vm292_vm4, %v1110_v50, 0 }
 0x4ea   : > { %v709_v58 = vmul.f32 1.442695, %v707_v57  ;;  %v924_v48 = vpack.c.bf16 %v881_v42, %v881_v42  ;;  %v776_v57 = vrot.slane %v3285_v31, 7 }
 0x4eb   : > { %v706_v59 = vpop.xlane.xlu1 %705 }
 0x4ec   : > { %2898 = vpow2.f32 %v709_v58  ;;  %v708_v60 = vsub.f32 %v697_v49, %v706_v59  ;;  %v723_v49 = vpack.c.bf16 %v615_v45, %v615_v45  ;;  %v929_v51 = vsel %vm382_vm6, %v924_v48, 0 }
 0x4ed   : > { %v778_v58 = vrot.slane %v3288_v32, 6  ;;  %v777_v59 = vsel %vm276_vm1, %v776_v57, %v3293_v35 }
 0x4ee   : > { %v711_v61 = vmul.f32 1.442695, %v708_v60  ;;  %v780_v60 = vrot.slane %v3296_v36, 5 }
 0x4f0   : > { %2900 = vpow2.f32 %v711_v61  ;;  %v779_v61 = vsel %vm279_vm2, %v778_v58, %v777_v59 }
 0x4f9   : > { %v2899_v62 = vpop.eup %2898 }
 0x4fa   : > { %v713_v63 = vsel %vm427_vm8, %v2899_v62, 0.0 }
 0x4fb   : > { %714 = vadd.xlane.f32.xlu0 %v713_v63  ;;  %v781_v63 = vsel %vm282_vm3, %v780_v60, %v779_v61 }
 0x4fd   : > { %v2901_v0 = vpop.eup %2900 }
 0x4fe   : > { %v716_v5 = vsel %vm427_vm8, %v2901_v0, 0.0 }
 0x4ff   : > { %717 = vadd.xlane.f32.xlu0 %v716_v5 }
 0x52c   : > { %891 = vxpose.xlu0.b32.start.end [1/1] (short) (narrow) %v878_v6, 16 }
 0x584   : > { %v715_v7 = vpop.xlane.xlu0 %714 }
 0x585   : > { %2902 = vrcp.f32 %v715_v7 }
 0x588   : > { %v718_v9 = vpop.xlane.xlu0 %717 }
 0x589   : > { %2904 = vrcp.f32 %v718_v9 }
 0x592   : > { %v2903_v20 = vpop.eup %2902 }
 0x593   : > { %v721_v25 = vmul.f32 %v2903_v20, %v2899_v62 }
 0x596   : > { %v2905_v2 = vpop.eup %2904 }
 0x597   : > { %v722_v34 = vmul.f32 %v2905_v2, %v2901_v0 }
 0x599   : > { %v724_v40 = vpack.c.bf16 %v722_v34, %v721_v25 }
 0x59b   : > { %v729_v43 = vsel %vm427_vm8, %v724_v40, 0 }
 0x59c   : > { %2680 = vmatpush3.bf16.xpose.msra.mxu1 %v729_v43 }
 0x59d   : > { %2691 = vmatprep.subr.bf16.mxu1 %v3085_v28 }
 0x5a3   : > { %2682 = vmatmul.mubr.msk.bf16.vlgmr.msra.gmra.mxu1 %vm427_vm8, %v723_v49  ;;  %v3483_v49 = vld [vmem:[%s3224_s3 + $0xc] sm:$0x1] }
 0x5a4   : > { %2692 = vmatpush3.bf16.msra.mxu1 %v929_v51  ;;  %2693 = vmatprep.mubr.msk.bf16.mxu1 %vm3086_vm5, %v3085_v28  ;;  %v1364_v51 = vpack.c.bf16 %v3483_v49, %v3483_v49 }
 0x5a5   : > { %2796 = vmatprep.subr.msk.bf16.mxu1 %vm292_vm4, %v1110_v50  ;;  %v3486_v50 = vld [vmem:[%s3224_s3 + $0x14] sm:$0x1] }
 0x5a6   : > { %v1372_v57 = vunpack.c.l.b16 %v1364_v51 }
 0x5a8   : > { %v907_v53 = vpop.trf.xlu0 }
 0x5ac   : > { %v908_v54 = vpop.trf.xlu0 }
 0x5ad   : > { %v923_v8 = vpack.c.bf16 %v908_v54, %v907_v53  ;;  %v3491_v53 = vld [vmem:[%s3224_s3 + $0x4] sm:$0x1]  ;;  %v3494_v54 = vld [vmem:[%s3224_s3 + $0x1c] sm:$0x1] }
 0x5ae   : > { %v1366_v58 = vpack.c.bf16 %v3494_v54, %v3494_v54 }
 0x5af   : > { %2694 = vmatmul.mubr.msk.bf16.vlgmr.msra.gmra.mxu1 %vm378_vm7, %v923_v8  ;;  %v1365_v8 = vpack.c.bf16 %v3486_v50, %v3486_v50 }
 0x5b0   : > { %2704 = vmatpush3.bf16.msra.mxu1 %v1112_v55  ;;  %2705 = vmatprep.mubr.msk.bf16.mxu1 %vm285_vm0, %v3256_v11  ;;  %v1363_v55 = vpack.c.bf16 %v3491_v53, %v3491_v53 }
 0x5b1   : > { %2715 = vmatprep.subr.bf16.mxu1 %v3085_v28  ;;  %v1373_v59 = vunpack.c.l.b16 %v1365_v8 }
 0x5b2   : > { %v1371_v61 = vunpack.c.l.b16 %v1363_v55 }
 0x5b7   : > { %2706 = vmatmul.mubr.msk.bf16.vlgmr.msra.gmra.mxu1 %vm285_vm0, %v3274_v27 }
 0x5b8   : > { %2717 = vmatprep.mubr.msk.bf16.mxu1 %vm3086_vm5, %v3085_v28 }
 0x663   : > { %v765_v62 = vpop.f32.mrf.mxu1 }
 0x664   : > { %v771_v0 = vmul.f32 %v765_v62, %v3386_v22  ;;  %v1375_v62 = vrot.slane %v1372_v57, 7 }
 0x665   : > { %v2683_v5 = vpop.f32.mrf.mxu1 }
 0x666   : > { %v783_v31 = vadd.f32 %v781_v63, %v771_v0  ;;  %v1374_v0 = vunpack.c.l.b16 %v1366_v58 }
 0x667   : > { %v768_v6 = vpop.f32.mrf.mxu1 }
 0x668   : > { %v791_v32 = vrot.slane %v783_v31, %v3390_v24  ;;  %v1377_v6 = vrot.slane %v1373_v59, 6 }
 0x669   : > { %v2684_v7 = vpop.f32.mrf.mxu1 }
 0x66a   : > { %v792_v9 = vcombine.high %v791_v32, %v791_v32  ;;  %v799_v35 = vrot.slane %v791_v32, %v3390_v24  ;;  %v1376_v7 = vsel %vm276_vm1, %v1375_v62, %v1371_v61 }
 0x66c   : > { %v806_v36 = vrot.slane %v792_v9, %v3390_v24  ;;  %v807_v12 = vcombine.high %v799_v35, %v799_v35  ;;  %813 = vst.msk [vmem:[%s3397_s5 + $0x1] sm:$0x1] %vm541_vm9, %v799_v35  ;;  %v1379_v35 = vrot.slane %v1374_v0, 5 }
 0x66e   : > { %v808_v15 = vcombine.high %v806_v36, %v806_v36  ;;  %814 = vst.msk [vmem:[%s3397_s5 + $0x9] sm:$0x1] %vm541_vm9, %v806_v36  ;;  %815 = vst.msk [vmem:[%s3397_s5 + $0x11] sm:$0x1] %vm541_vm9, %v807_v12 }
 0x66f   : > { %v965_v16 = vpop.f32.mrf.mxu1 }
 0x670   : > { %816 = vst.msk [vmem:[%s3397_s5 + $0x19] sm:$0x1] %vm541_vm9, %v808_v15  ;;  %v972_v17 = vsel %vm427_vm8, %v965_v16, -inf  ;;  %v1378_v15 = vsel %vm279_vm2, %v1377_v6, %v1376_v7 }
 0x671   : > { %973 = vmax.xlane.f32.xlu1 %v972_v17  ;;  %v2695_v18 = vpop.f32.mrf.mxu1  ;;  %v1380_v17 = vsel %vm282_vm3, %v1379_v35, %v1378_v15 }
 0x673   : > { %v968_v19 = vpop.f32.mrf.mxu1 }
 0x674   : > { %v975_v20 = vsel %vm427_vm8, %v968_v19, -inf }
 0x675   : > { %976 = vmax.xlane.f32.xlu1 %v975_v20  ;;  %v2696_v21 = vpop.f32.mrf.mxu1  ;;  %v1381_v20 = vpack.c.b16 %v1380_v17, %v1380_v17 }
 0x677   : > { %v3477_v23 = vpop.f32.mrf.mxu1 }
 0x679   : > { %v1148_v2 = vpop.f32.mrf.mxu1 }
 0x67a   : > { %v1149_v45 = vadd.f32 %v1148_v2, %v3280_v29 }
 0x67b   : > { %v2708_v3 = vpop.f32.mrf.mxu1 }
 0x67d   : > { %v1151_v32 = vpop.f32.mrf.mxu1 }
 0x67e   : > { %v1152_v36 = vadd.f32 %v1151_v32, %v3305_v47 }
 0x680   : > { %v1195_v18 = vpack.c.bf16 %v1152_v36, %v1152_v36 }
 0x682   : > { %v1200_v21 = vsel %vm382_vm6, %v1195_v18, 0 }
 0x6fa   : > { %v974_v25 = vpop.xlane.xlu1 %973 }
 0x6fb   : > { %v978_v34 = vsub.f32 %v965_v16, %v974_v25  ;;  %v886_v16 = vadd.f32 %v3409_v52, %v3357_v56  ;;  %v1383_v25 = vsel %vm292_vm4, %v1381_v20, 0 }
 0x6fd   : > { %v980_v39 = vmul.f32 1.442695, %v978_v34  ;;  %v1047_v34 = vrot.slane %v3337_v26, 7 }
 0x6fe   : > { %v977_v1 = vpop.xlane.xlu1 %976 }
 0x6ff   : > { %2906 = vpow2.f32 %v980_v39  ;;  %v979_v4 = vsub.f32 %v968_v19, %v977_v1  ;;  %v994_v19 = vpack.c.bf16 %v886_v16, %v886_v16  ;;  %v1049_v39 = vrot.slane %v3340_v33, 6 }
 0x700   : > { %v1048_v1 = vsel %vm276_vm1, %v1047_v34, %v3345_v37 }
 0x701   : > { %v982_v40 = vmul.f32 1.442695, %v979_v4  ;;  %v1051_v4 = vrot.slane %v3348_v38, 5 }
 0x703   : > { %2908 = vpow2.f32 %v982_v40  ;;  %v1050_v40 = vsel %vm279_vm2, %v1049_v39, %v1048_v1 }
 0x70c   : > { %v2907_v41 = vpop.eup %2906 }
 0x70d   : > { %v984_v42 = vsel %vm427_vm8, %v2907_v41, 0.0 }
 0x70e   : > { %985 = vadd.xlane.f32.xlu1 %v984_v42  ;;  %v1052_v42 = vsel %vm282_vm3, %v1051_v4, %v1050_v40 }
 0x710   : > { %v2909_v43 = vpop.eup %2908 }
 0x711   : > { %v987_v44 = vsel %vm427_vm8, %v2909_v43, 0.0 }
 0x712   : > { %988 = vadd.xlane.f32.xlu0 %v987_v44 }
 0x741   : > { %1162 = vxpose.xlu1.b32.start.end [1/1] (short) (narrow) %v1149_v45, 16 }
 0x797   : > { %v986_v46 = vpop.xlane.xlu1 %985 }
 0x798   : > { %2910 = vrcp.f32 %v986_v46 }
 0x79b   : > { %v989_v48 = vpop.xlane.xlu0 %988 }
 0x79c   : > { %2912 = vrcp.f32 %v989_v48 }
 0x7a5   : > { %v2911_v60 = vpop.eup %2910 }
 0x7a6   : > { %v992_v5 = vmul.f32 %v2911_v60, %v2907_v41 }
 0x7a9   : > { %v2913_v63 = vpop.eup %2912 }
 0x7aa   : > { %v993_v31 = vmul.f32 %v2913_v63, %v2909_v43 }
 0x7ac   : > { %v995_v9 = vpack.c.bf16 %v993_v31, %v992_v5 }
 0x7ae   : > { %v1000_v12 = vsel %vm427_vm8, %v995_v9, 0 }
 0x7af   : > { %2698 = vmatpush3.bf16.xpose.msra.mxu0 %v1000_v12 }
 0x7b0   : > { %2709 = vmatprep.subr.bf16.mxu0 %v3085_v28 }
 0x7b6   : > { %2700 = vmatmul.mubr.msk.bf16.vlgmr.msra.gmra.mxu0 %vm427_vm8, %v994_v19  ;;  %v3551_v19 = vld [vmem:[%s3224_s3 + $0xd] sm:$0x1] }
 0x7b7   : > { %2710 = vmatpush3.bf16.msra.mxu0 %v1200_v21  ;;  %2711 = vmatprep.mubr.msk.bf16.mxu0 %vm3086_vm5, %v3085_v28  ;;  %v1635_v21 = vpack.c.bf16 %v3551_v19, %v3551_v19 }
 0x7b8   : > { %2797 = vmatprep.subr.msk.bf16.mxu0 %vm292_vm4, %v1381_v20  ;;  %v3554_v20 = vld [vmem:[%s3224_s3 + $0x15] sm:$0x1] }
 0x7b9   : > { %v1643_v34 = vunpack.c.l.b16 %v1635_v21 }
 0x7bd   : > { %v1178_v2 = vpop.trf.xlu1 }
 0x7c1   : > { %v1179_v3 = vpop.trf.xlu1 }
 0x7c2   : > { %v1194_v52 = vpack.c.bf16 %v1179_v3, %v1178_v2  ;;  %v3559_v2 = vld [vmem:[%s3224_s3 + $0x5] sm:$0x1]  ;;  %v3562_v3 = vld [vmem:[%s3224_s3 + $0x1d] sm:$0x1] }
 0x7c3   : > { %v1637_v39 = vpack.c.bf16 %v3562_v3, %v3562_v3 }
 0x7c4   : > { %2712 = vmatmul.mubr.msk.bf16.vlgmr.msra.gmra.mxu0 %vm378_vm7, %v1194_v52  ;;  %v1636_v52 = vpack.c.bf16 %v3554_v20, %v3554_v20 }
 0x7c5   : > { %2722 = vmatpush3.bf16.msra.mxu0 %v1383_v25  ;;  %2723 = vmatprep.mubr.msk.bf16.mxu0 %vm285_vm0, %v3256_v11  ;;  %v1634_v25 = vpack.c.bf16 %v3559_v2, %v3559_v2 }
 0x7c6   : > { %2733 = vmatprep.subr.bf16.mxu0 %v3085_v28  ;;  %v1644_v1 = vunpack.c.l.b16 %v1636_v52 }
 0x7c7   : > { %v1642_v40 = vunpack.c.l.b16 %v1634_v25 }
 0x7cc   : > { %2724 = vmatmul.mubr.msk.bf16.vlgmr.msra.gmra.mxu0 %vm285_vm0, %v3274_v27 }
 0x7cd   : > { %2735 = vmatprep.mubr.msk.bf16.mxu0 %vm3086_vm5, %v3085_v28 }
 0x876   : > { %v1036_v41 = vpop.f32.mrf.mxu0 }
 0x877   : > { %v1042_v43 = vmul.f32 %v1036_v41, %v3386_v22  ;;  %v1646_v41 = vrot.slane %v1643_v34, 7 }
 0x878   : > { %v2701_v44 = vpop.f32.mrf.mxu0 }
 0x879   : > { %v1054_v26 = vadd.f32 %v1052_v42, %v1042_v43  ;;  %v1645_v43 = vunpack.c.l.b16 %v1637_v39 }
 0x87a   : > { %v1039_v45 = vpop.f32.mrf.mxu0 }
 0x87b   : > { %v1062_v33 = vrot.slane %v1054_v26, %v3390_v24  ;;  %v1648_v45 = vrot.slane %v1644_v1, 6 }
 0x87c   : > { %v2702_v46 = vpop.f32.mrf.mxu0 }
 0x87d   : > { %v1063_v48 = vcombine.high %v1062_v33, %v1062_v33  ;;  %v1070_v37 = vrot.slane %v1062_v33, %v3390_v24  ;;  %v1647_v46 = vsel %vm276_vm1, %v1646_v41, %v1642_v40 }
 0x87f   : > { %v1077_v38 = vrot.slane %v1063_v48, %v3390_v24  ;;  %v1078_v51 = vcombine.high %v1070_v37, %v1070_v37  ;;  %1084 = vst.msk [vmem:[%s3397_s5 + $0x2] sm:$0x1] %vm541_vm9, %v1070_v37  ;;  %v1650_v37 = vrot.slane %v1645_v43, 5 }
 0x881   : > { %v1079_v8 = vcombine.high %v1077_v38, %v1077_v38  ;;  %1085 = vst.msk [vmem:[%s3397_s5 + $0xa] sm:$0x1] %vm541_vm9, %v1077_v38  ;;  %1086 = vst.msk [vmem:[%s3397_s5 + $0x12] sm:$0x1] %vm541_vm9, %v1078_v51 }
 0x883   : > { %1087 = vst.msk [vmem:[%s3397_s5 + $0x1a] sm:$0x1] %vm541_vm9, %v1079_v8  ;;  %v1649_v8 = vsel %vm279_vm2, %v1648_v45, %v1647_v46 }
 0x884   : > { %v1236_v55 = vpop.f32.mrf.mxu0 }
 0x885   : > { %v1243_v57 = vsel %vm427_vm8, %v1236_v55, -inf }
 0x886   : > { %1244 = vmax.xlane.f32.xlu0 %v1243_v57  ;;  %v2713_v58 = vpop.f32.mrf.mxu0  ;;  %v1651_v57 = vsel %vm282_vm3, %v1650_v37, %v1649_v8 }
 0x888   : > { %v1239_v59 = vpop.f32.mrf.mxu0 }
 0x889   : > { %v1246_v60 = vsel %vm427_vm8, %v1239_v59, -inf }
 0x88a   : > { %1247 = vmax.xlane.f32.xlu1 %v1246_v60  ;;  %v2714_v61 = vpop.f32.mrf.mxu0  ;;  %v1652_v60 = vpack.c.b16 %v1651_v57, %v1651_v57 }
 0x88c   : > { %v3545_v62 = vpop.f32.mrf.mxu0 }
 0x88e   : > { %v1419_v63 = vpop.f32.mrf.mxu0 }
 0x88f   : > { %v1420_v16 = vadd.f32 %v1419_v63, %v3280_v29 }
 0x890   : > { %v2726_v0 = vpop.f32.mrf.mxu0 }
 0x892   : > { %v1422_v33 = vpop.f32.mrf.mxu0 }
 0x893   : > { %v1423_v38 = vadd.f32 %v1422_v33, %v3305_v47 }
 0x895   : > { %v1466_v58 = vpack.c.bf16 %v1423_v38, %v1423_v38 }
 0x897   : > { %v1471_v61 = vsel %vm382_vm6, %v1466_v58, 0 }
 0x90f   : > { %v1245_v5 = vpop.xlane.xlu0 %1244 }
 0x910   : > { %v1249_v31 = vsub.f32 %v1236_v55, %v1245_v5  ;;  %v1157_v55 = vadd.f32 %v3477_v23, %v3357_v56  ;;  %v1654_v5 = vsel %vm292_vm4, %v1652_v60, 0 }
 0x912   : > { %v1251_v6 = vmul.f32 1.442695, %v1249_v31  ;;  %v1318_v31 = vrot.slane %v3415_v30, 7 }
 0x913   : > { %v1248_v32 = vpop.xlane.xlu1 %1247 }
 0x914   : > { %2914 = vpow2.f32 %v1251_v6  ;;  %v1250_v7 = vsub.f32 %v1239_v59, %v1248_v32  ;;  %v1265_v59 = vpack.c.bf16 %v1157_v55, %v1157_v55  ;;  %v1320_v6 = vrot.slane %v3418_v10, 6 }
 0x915   : > { %v1319_v32 = vsel %vm276_vm1, %v1318_v31, %v3423_v13 }
 0x916   : > { %v1253_v9 = vmul.f32 1.442695, %v1250_v7  ;;  %v1322_v7 = vrot.slane %v3426_v14, 5 }
 0x918   : > { %2916 = vpow2.f32 %v1253_v9  ;;  %v1321_v9 = vsel %vm279_vm2, %v1320_v6, %v1319_v32 }
 0x921   : > { %v2915_v35 = vpop.eup %2914 }
 0x922   : > { %v1255_v36 = vsel %vm427_vm8, %v2915_v35, 0.0 }
 0x923   : > { %1256 = vadd.xlane.f32.xlu0 %v1255_v36  ;;  %v1323_v36 = vsel %vm282_vm3, %v1322_v7, %v1321_v9 }
 0x925   : > { %v2917_v12 = vpop.eup %2916 }
 0x926   : > { %v1258_v15 = vsel %vm427_vm8, %v2917_v12, 0.0 }
 0x927   : > { %1259 = vadd.xlane.f32.xlu0 %v1258_v15 }
 0x954   : > { %1433 = vxpose.xlu0.b32.start.end [1/1] (short) (narrow) %v1420_v16, 16 }
 0x9ac   : > { %v1257_v17 = vpop.xlane.xlu0 %1256 }
 0x9ad   : > { %2918 = vrcp.f32 %v1257_v17 }
 0x9b0   : > { %v1260_v18 = vpop.xlane.xlu0 %1259 }
 0x9b1   : > { %2920 = vrcp.f32 %v1260_v18 }
 0x9ba   : > { %v2919_v4 = vpop.eup %2918 }
 0x9bb   : > { %v1263_v44 = vmul.f32 %v2919_v4, %v2915_v35 }
 0x9be   : > { %v2921_v42 = vpop.eup %2920 }
 0x9bf   : > { %v1264_v26 = vmul.f32 %v2921_v42, %v2917_v12 }
 0x9c1   : > { %v1266_v48 = vpack.c.bf16 %v1264_v26, %v1263_v44 }
 0x9c3   : > { %v1271_v51 = vsel %vm427_vm8, %v1266_v48, 0 }
 0x9c4   : > { %2716 = vmatpush3.bf16.xpose.msra.mxu1 %v1271_v51 }
 0x9c5   : > { %2727 = vmatprep.subr.bf16.mxu1 %v3085_v28 }
 0x9cb   : > { %2718 = vmatmul.mubr.msk.bf16.vlgmr.msra.gmra.mxu1 %vm427_vm8, %v1265_v59  ;;  %v3619_v59 = vld [vmem:[%s3224_s3 + $0xe] sm:$0x1] }
 0x9cc   : > { %2728 = vmatpush3.bf16.msra.mxu1 %v1471_v61  ;;  %2729 = vmatprep.mubr.msk.bf16.mxu1 %vm3086_vm5, %v3085_v28  ;;  %v1906_v61 = vpack.c.bf16 %v3619_v59, %v3619_v59 }
 0x9cd   : > { %2798 = vmatprep.subr.msk.bf16.mxu1 %vm292_vm4, %v1652_v60  ;;  %v3622_v60 = vld [vmem:[%s3224_s3 + $0x16] sm:$0x1] }
 0x9ce   : > { %v1914_v31 = vunpack.c.l.b16 %v1906_v61 }
 0x9d0   : > { %v1449_v63 = vpop.trf.xlu0 }
 0x9d4   : > { %v1450_v0 = vpop.trf.xlu0 }
 0x9d5   : > { %v1465_v23 = vpack.c.bf16 %v1450_v0, %v1449_v63  ;;  %v3627_v63 = vld [vmem:[%s3224_s3 + $0x6] sm:$0x1]  ;;  %v3630_v0 = vld [vmem:[%s3224_s3 + $0x1e] sm:$0x1] }
 0x9d6   : > { %v1908_v6 = vpack.c.bf16 %v3630_v0, %v3630_v0 }
 0x9d7   : > { %2730 = vmatmul.mubr.msk.bf16.vlgmr.msra.gmra.mxu1 %vm378_vm7, %v1465_v23  ;;  %v1907_v23 = vpack.c.bf16 %v3622_v60, %v3622_v60 }
 0x9d8   : > { %2740 = vmatpush3.bf16.msra.mxu1 %v1654_v5  ;;  %2741 = vmatprep.mubr.msk.bf16.mxu1 %vm285_vm0, %v3256_v11  ;;  %v1905_v5 = vpack.c.bf16 %v3627_v63, %v3627_v63 }
 0x9d9   : > { %2751 = vmatprep.subr.bf16.mxu1 %v3085_v28  ;;  %v1915_v32 = vunpack.c.l.b16 %v1907_v23 }
 0x9da   : > { %v1913_v9 = vunpack.c.l.b16 %v1905_v5 }
 0x9df   : > { %2742 = vmatmul.mubr.msk.bf16.vlgmr.msra.gmra.mxu1 %vm285_vm0, %v3274_v27 }
 0x9e0   : > { %2753 = vmatprep.mubr.msk.bf16.mxu1 %vm3086_vm5, %v3085_v28 }
 0xa8b   : > { %v1307_v35 = vpop.f32.mrf.mxu1 }
 0xa8c   : > { %v1313_v12 = vmul.f32 %v1307_v35, %v3386_v22  ;;  %v1917_v35 = vrot.slane %v1914_v31, 7 }
 0xa8d   : > { %v2719_v15 = vpop.f32.mrf.mxu1 }
 0xa8e   : > { %v1325_v30 = vadd.f32 %v1323_v36, %v1313_v12  ;;  %v1916_v12 = vunpack.c.l.b16 %v1908_v6 }
 0xa8f   : > { %v1310_v16 = vpop.f32.mrf.mxu1 }
 0xa90   : > { %v1333_v10 = vrot.slane %v1325_v30, %v3390_v24  ;;  %v1919_v16 = vrot.slane %v1915_v32, 6 }
 0xa91   : > { %v2720_v17 = vpop.f32.mrf.mxu1 }
 0xa92   : > { %v1334_v18 = vcombine.high %v1333_v10, %v1333_v10  ;;  %v1341_v13 = vrot.slane %v1333_v10, %v3390_v24  ;;  %v1918_v17 = vsel %vm276_vm1, %v1917_v35, %v1913_v9 }
 0xa94   : > { %v1348_v14 = vrot.slane %v1334_v18, %v3390_v24  ;;  %v1349_v21 = vcombine.high %v1341_v13, %v1341_v13  ;;  %1355 = vst.msk [vmem:[%s3397_s5 + $0x3] sm:$0x1] %vm541_vm9, %v1341_v13  ;;  %v1921_v13 = vrot.slane %v1916_v12, 5 }
 0xa96   : > { %v1350_v52 = vcombine.high %v1348_v14, %v1348_v14  ;;  %1356 = vst.msk [vmem:[%s3397_s5 + $0xb] sm:$0x1] %vm541_vm9, %v1348_v14  ;;  %1357 = vst.msk [vmem:[%s3397_s5 + $0x13] sm:$0x1] %vm541_vm9, %v1349_v21 }
 0xa97   : > { %v1507_v25 = vpop.f32.mrf.mxu1 }
 0xa98   : > { %1358 = vst.msk [vmem:[%s3397_s5 + $0x1b] sm:$0x1] %vm541_vm9, %v1350_v52  ;;  %v1514_v34 = vsel %vm427_vm8, %v1507_v25, -inf  ;;  %v1920_v52 = vsel %vm279_vm2, %v1919_v16, %v1918_v17 }
 0xa99   : > { %1515 = vmax.xlane.f32.xlu1 %v1514_v34  ;;  %v2731_v39 = vpop.f32.mrf.mxu1  ;;  %v1922_v34 = vsel %vm282_vm3, %v1921_v13, %v1920_v52 }
 0xa9b   : > { %v1510_v1 = vpop.f32.mrf.mxu1 }
 0xa9c   : > { %v1517_v4 = vsel %vm427_vm8, %v1510_v1, -inf }
 0xa9d   : > { %1518 = vmax.xlane.f32.xlu1 %v1517_v4  ;;  %v2732_v40 = vpop.f32.mrf.mxu1  ;;  %v1923_v4 = vpack.c.b16 %v1922_v34, %v1922_v34 }
 0xa9f   : > { %v3613_v41 = vpop.f32.mrf.mxu1 }
 0xaa1   : > { %v1690_v42 = vpop.f32.mrf.mxu1 }
 0xaa2   : > { %v1691_v55 = vadd.f32 %v1690_v42, %v3280_v29 }
 0xaa3   : > { %v2744_v43 = vpop.f32.mrf.mxu1 }
 0xaa5   : > { %v1693_v10 = vpop.f32.mrf.mxu1 }
 0xaa6   : > { %v1694_v14 = vadd.f32 %v1693_v10, %v3305_v47 }
 0xaa8   : > { %v1737_v39 = vpack.c.bf16 %v1694_v14, %v1694_v14 }
 0xaaa   : > { %v1742_v40 = vsel %vm382_vm6, %v1737_v39, 0 }
 0xb22   : > { %v1516_v44 = vpop.xlane.xlu1 %1515 }
 0xb23   : > { %v1520_v26 = vsub.f32 %v1507_v25, %v1516_v44  ;;  %v1428_v25 = vadd.f32 %v3545_v62, %v3357_v56  ;;  %v1925_v44 = vsel %vm292_vm4, %v1923_v4, 0 }
 0xb25   : > { %v1522_v45 = vmul.f32 1.442695, %v1520_v26  ;;  %v1589_v26 = vrot.slane %v3483_v49, 7 }
 0xb26   : > { %v1519_v33 = vpop.xlane.xlu1 %1518 }
 0xb27   : > { %2922 = vpow2.f32 %v1522_v45  ;;  %v1521_v46 = vsub.f32 %v1510_v1, %v1519_v33  ;;  %v1536_v1 = vpack.c.bf16 %v1428_v25, %v1428_v25  ;;  %v1591_v45 = vrot.slane %v3486_v50, 6 }
 0xb28   : > { %v1590_v33 = vsel %vm276_vm1, %v1589_v26, %v3491_v53 }
 0xb29   : > { %v1524_v48 = vmul.f32 1.442695, %v1521_v46  ;;  %v1593_v46 = vrot.slane %v3494_v54, 5 }
 0xb2b   : > { %2924 = vpow2.f32 %v1524_v48  ;;  %v1592_v48 = vsel %vm279_vm2, %v1591_v45, %v1590_v33 }
 0xb34   : > { %v2923_v37 = vpop.eup %2922 }
 0xb35   : > { %v1526_v38 = vsel %vm427_vm8, %v2923_v37, 0.0 }
 0xb36   : > { %1527 = vadd.xlane.f32.xlu1 %v1526_v38  ;;  %v1594_v38 = vsel %vm282_vm3, %v1593_v46, %v1592_v48 }
 0xb38   : > { %v2925_v51 = vpop.eup %2924 }
 0xb39   : > { %v1529_v8 = vsel %vm427_vm8, %v2925_v51, 0.0 }
 0xb3a   : > { %1530 = vadd.xlane.f32.xlu0 %v1529_v8 }
 0xb69   : > { %1704 = vxpose.xlu1.b32.start.end [1/1] (short) (narrow) %v1691_v55, 16 }
 0xbbf   : > { %v1528_v57 = vpop.xlane.xlu1 %1527 }
 0xbc0   : > { %2926 = vrcp.f32 %v1528_v57 }
 0xbc3   : > { %v1531_v58 = vpop.xlane.xlu0 %1530 }
 0xbc4   : > { %2928 = vrcp.f32 %v1531_v58 }
 0xbcd   : > { %v2927_v7 = vpop.eup %2926 }
 0xbce   : > { %v1534_v15 = vmul.f32 %v2927_v7, %v2923_v37 }
 0xbd1   : > { %v2929_v36 = vpop.eup %2928 }
 0xbd2   : > { %v1535_v30 = vmul.f32 %v2929_v36, %v2925_v51 }
 0xbd4   : > { %v1537_v18 = vpack.c.bf16 %v1535_v30, %v1534_v15 }
 0xbd6   : > { %v1542_v21 = vsel %vm427_vm8, %v1537_v18, 0 }
 0xbd7   : > { %2734 = vmatpush3.bf16.xpose.msra.mxu0 %v1542_v21 }
 0xbd8   : > { %2745 = vmatprep.subr.bf16.mxu0 %v3085_v28 }
 0xbde   : > { %2736 = vmatmul.mubr.msk.bf16.vlgmr.msra.gmra.mxu0 %vm427_vm8, %v1536_v1  ;;  %v3687_v1 = vld [vmem:[%s3224_s3 + $0xf] sm:$0x1] }
 0xbdf   : > { %2746 = vmatpush3.bf16.msra.mxu0 %v1742_v40  ;;  %2747 = vmatprep.mubr.msk.bf16.mxu0 %vm3086_vm5, %v3085_v28  ;;  %v2177_v40 = vpack.c.bf16 %v3687_v1, %v3687_v1 }
 0xbe0   : > { %2799 = vmatprep.subr.msk.bf16.mxu0 %vm292_vm4, %v1923_v4  ;;  %v3690_v4 = vld [vmem:[%s3224_s3 + $0x17] sm:$0x1] }
 0xbe1   : > { %v2185_v26 = vunpack.c.l.b16 %v2177_v40 }
 0xbe5   : > { %v1720_v42 = vpop.trf.xlu1 }
 0xbe9   : > { %v1721_v43 = vpop.trf.xlu1 }
 0xbea   : > { %v1736_v62 = vpack.c.bf16 %v1721_v43, %v1720_v42  ;;  %v3695_v42 = vld [vmem:[%s3224_s3 + $0x7] sm:$0x1]  ;;  %v3698_v43 = vld [vmem:[%s3224_s3 + $0x1f] sm:$0x1]  ;;  %s2455_s3 = sadd.s32 %s3062_s20, %s2589_s14 }
 0xbeb   : > { %v2179_v45 = vpack.c.bf16 %v3698_v43, %v3698_v43  ;;  %s2590_s16 = sshll.u32 %s2455_s3, 7 }
 0xbec   : > { %2748 = vmatmul.mubr.msk.bf16.vlgmr.msra.gmra.mxu0 %vm378_vm7, %v1736_v62  ;;  %v2178_v62 = vpack.c.bf16 %v3690_v4, %v3690_v4  ;;  %s3810_s20 = scalar_lea.hbm %s3875_s4, %s2590_s16 }
 0xbed   : > { %2758 = vmatpush3.bf16.msra.mxu0 %v1925_v44  ;;  %2759 = vmatprep.mubr.msk.bf16.mxu0 %vm285_vm0, %v3256_v11  ;;  %v2176_v44 = vpack.c.bf16 %v3695_v42, %v3695_v42 }
 0xbee   : > { %2769 = vmatprep.subr.bf16.mxu0 %v3085_v28  ;;  %v2186_v33 = vunpack.c.l.b16 %v2178_v62 }
 0xbef   : > { %v2184_v48 = vunpack.c.l.b16 %v2176_v44 }
 0xbf4   : > { %2760 = vmatmul.mubr.msk.bf16.vlgmr.msra.gmra.mxu0 %vm285_vm0, %v3274_v27 }
 0xbf5   : > { %2771 = vmatprep.mubr.msk.bf16.mxu0 %vm3086_vm5, %v3085_v28 }
 0xc9e   : > { %v1578_v37 = vpop.f32.mrf.mxu0 }
 0xc9f   : > { %v1584_v51 = vmul.f32 %v1578_v37, %v3386_v22  ;;  %v2188_v37 = vrot.slane %v2185_v26, 7 }
 0xca0   : > { %v2737_v8 = vpop.f32.mrf.mxu0 }
 0xca1   : > { %v1596_v49 = vadd.f32 %v1594_v38, %v1584_v51  ;;  %v2187_v51 = vunpack.c.l.b16 %v2179_v45 }
 0xca2   : > { %v1581_v55 = vpop.f32.mrf.mxu0 }
 0xca3   : > { %v1604_v50 = vrot.slane %v1596_v49, %v3390_v24  ;;  %v2190_v55 = vrot.slane %v2186_v33, 6 }
 0xca4   : > { %v2738_v57 = vpop.f32.mrf.mxu0 }
 0xca5   : > { %v1605_v58 = vcombine.high %v1604_v50, %v1604_v50  ;;  %v1612_v53 = vrot.slane %v1604_v50, %v3390_v24  ;;  %v2189_v57 = vsel %vm276_vm1, %v2188_v37, %v2184_v48 }
 0xca7   : > { %v1619_v54 = vrot.slane %v1605_v58, %v3390_v24  ;;  %v1620_v61 = vcombine.high %v1612_v53, %v1612_v53  ;;  %1626 = vst.msk [vmem:[%s3397_s5 + $0x4] sm:$0x1] %vm541_vm9, %v1612_v53  ;;  %v2192_v53 = vrot.slane %v2187_v51, 5 }
 0xca9   : > { %v1621_v23 = vcombine.high %v1619_v54, %v1619_v54  ;;  %1627 = vst.msk [vmem:[%s3397_s5 + $0xc] sm:$0x1] %vm541_vm9, %v1619_v54  ;;  %1628 = vst.msk [vmem:[%s3397_s5 + $0x14] sm:$0x1] %vm541_vm9, %v1620_v61 }
 0xcab   : > { %1629 = vst.msk [vmem:[%s3397_s5 + $0x1c] sm:$0x1] %vm541_vm9, %v1621_v23  ;;  %v2191_v23 = vsel %vm279_vm2, %v2190_v55, %v2189_v57 }
 0xcac   : > { %v1778_v5 = vpop.f32.mrf.mxu0 }
 0xcad   : > { %v1785_v31 = vsel %vm427_vm8, %v1778_v5, -inf }
 0xcae   : > { %1786 = vmax.xlane.f32.xlu0 %v1785_v31  ;;  %v2749_v6 = vpop.f32.mrf.mxu0  ;;  %v2193_v31 = vsel %vm282_vm3, %v2192_v53, %v2191_v23 }
 0xcb0   : > { %v1781_v32 = vpop.f32.mrf.mxu0 }
 0xcb1   : > { %v1788_v7 = vsel %vm427_vm8, %v1781_v32, -inf }
 0xcb2   : > { %1789 = vmax.xlane.f32.xlu1 %v1788_v7  ;;  %v2750_v9 = vpop.f32.mrf.mxu0  ;;  %v2194_v7 = vpack.c.b16 %v2193_v31, %v2193_v31 }
 0xcb4   : > { %v3681_v35 = vpop.f32.mrf.mxu0 }
 0xcb6   : > { %v1961_v36 = vpop.f32.mrf.mxu0 }
 0xcb7   : > { %v1962_v25 = vadd.f32 %v1961_v36, %v3280_v29 }
 0xcb8   : > { %v2762_v12 = vpop.f32.mrf.mxu0 }
 0xcba   : > { %v1964_v50 = vpop.f32.mrf.mxu0 }
 0xcbb   : > { %v1965_v54 = vadd.f32 %v1964_v50, %v3305_v47 }
 0xcbd   : > { %v2008_v6 = vpack.c.bf16 %v1965_v54, %v1965_v54 }
 0xcbf   : > { %v2013_v9 = vsel %vm382_vm6, %v2008_v6, 0 }
 0xd37   : > { %v1787_v15 = vpop.xlane.xlu0 %1786 }
 0xd38   : > { %v1791_v30 = vsub.f32 %v1778_v5, %v1787_v15  ;;  %v1699_v5 = vadd.f32 %v3613_v41, %v3357_v56  ;;  %v2196_v15 = vsel %vm292_vm4, %v2194_v7, 0 }
 0xd3a   : > { %v1793_v16 = vmul.f32 1.442695, %v1791_v30  ;;  %v1860_v30 = vrot.slane %v3551_v19, 7 }
 0xd3b   : > { %v1790_v10 = vpop.xlane.xlu1 %1789 }
 0xd3c   : > { %2930 = vpow2.f32 %v1793_v16  ;;  %v1792_v17 = vsub.f32 %v1781_v32, %v1790_v10  ;;  %v1807_v32 = vpack.c.bf16 %v1699_v5, %v1699_v5  ;;  %v1862_v16 = vrot.slane %v3554_v20, 6 }
 0xd3d   : > { %v1861_v10 = vsel %vm276_vm1, %v1860_v30, %v3559_v2 }
 0xd3e   : > { %v1795_v18 = vmul.f32 1.442695, %v1792_v17  ;;  %v1864_v17 = vrot.slane %v3562_v3, 5 }
 0xd40   : > { %2932 = vpow2.f32 %v1795_v18 }
 0xd49   : > { %v2931_v13 = vpop.eup %2930 }
 0xd4a   : > { %v1797_v14 = vsel %vm427_vm8, %v2931_v13, 0.0 }
 0xd4b   : > { %1798 = vadd.xlane.f32.xlu0 %v1797_v14 }
 0xd4d   : > { %v2933_v21 = vpop.eup %2932 }
 0xd4e   : > { %v1800_v52 = vsel %vm427_vm8, %v2933_v21, 0.0 }
 0xd4f   : > { %1801 = vadd.xlane.f32.xlu0 %v1800_v52 }
 0xd7c   : > { %1975 = vxpose.xlu0.b32.start.end [1/1] (short) (narrow) %v1962_v25, 16 }
 0xdd4   : > { %v1799_v34 = vpop.xlane.xlu0 %1798 }
 0xdd5   : > { %2934 = vrcp.f32 %v1799_v34 }
 0xdd8   : > { %v1802_v39 = vpop.xlane.xlu0 %1801 }
 0xdd9   : > { %2936 = vrcp.f32 %v1802_v39 }
 0xde2   : > { %v2935_v46 = vpop.eup %2934 }
 0xde3   : > { %v1805_v8 = vmul.f32 %v2935_v46, %v2931_v13 }
 0xde6   : > { %v2937_v38 = vpop.eup %2936 }
 0xde7   : > { %v1806_v49 = vmul.f32 %v2937_v38, %v2933_v21 }
 0xde9   : > { %v1808_v58 = vpack.c.bf16 %v1806_v49, %v1805_v8 }
 0xdeb   : > { %v1813_v61 = vsel %vm427_vm8, %v1808_v58, 0 }
 0xdec   : > { %2752 = vmatpush3.bf16.xpose.msra.mxu1 %v1813_v61 }
 0xded   : > { %2763 = vmatprep.subr.bf16.mxu1 %v3085_v28 }
 0xdf3   : > { %2754 = vmatmul.mubr.msk.bf16.vlgmr.msra.gmra.mxu1 %vm427_vm8, %v1807_v32 }
 0xdf4   : > { %2764 = vmatpush3.bf16.msra.mxu1 %v2013_v9  ;;  %2765 = vmatprep.mubr.msk.bf16.mxu1 %vm3086_vm5, %v3085_v28 }
 0xdf5   : > { %2800 = vmatprep.subr.msk.bf16.mxu1 %vm292_vm4, %v2194_v7 }
 0xdf8   : > { %v1991_v36 = vpop.trf.xlu0 }
 0xdfc   : > { %v1992_v12 = vpop.trf.xlu0 }
 0xdfd   : > { %v2007_v41 = vpack.c.bf16 %v1992_v12, %v1991_v36 }
 0xdff   : > { %2766 = vmatmul.mubr.msk.bf16.vlgmr.msra.gmra.mxu1 %vm378_vm7, %v2007_v41 }
 0xe00   : > { %2776 = vmatpush3.bf16.msra.mxu1 %v2196_v15  ;;  %2777 = vmatprep.mubr.msk.bf16.mxu1 %vm285_vm0, %v3256_v11  ;;  %v1863_v11 = vsel %vm279_vm2, %v1862_v16, %v1861_v10  ;;  %v1970_v15 = vadd.f32 %v3681_v35, %v3357_v56  ;;  %v2133_v35 = vrot.slane %v3622_v60, 6 }
 0xe01   : > { %2787 = vmatprep.subr.bf16.mxu1 %v3085_v28 }
 0xe02   : > { %v2078_v30 = vpack.c.bf16 %v1970_v15, %v1970_v15 }
 0xe07   : > { %2778 = vmatmul.mubr.msk.bf16.vlgmr.msra.gmra.mxu1 %vm285_vm0, %v3274_v27  ;;  %v1865_v27 = vsel %vm282_vm3, %v1864_v17, %v1863_v11  ;;  %v2131_v11 = vrot.slane %v3619_v59, 7 }
 0xe08   : > { %2789 = vmatprep.mubr.msk.bf16.mxu1 %vm3086_vm5, %v3085_v28 }
 0xeb3   : > { %v1849_v18 = vpop.f32.mrf.mxu1 }
 0xeb4   : > { %v1855_v13 = vmul.f32 %v1849_v18, %v3386_v22  ;;  %v2132_v18 = vsel %vm276_vm1, %v2131_v11, %v3627_v63 }
 0xeb5   : > { %v2755_v14 = vpop.f32.mrf.mxu1 }
 0xeb6   : > { %v1867_v19 = vadd.f32 %v1865_v27, %v1855_v13  ;;  %v2135_v27 = vrot.slane %v3630_v0, 5  ;;  %v2134_v13 = vsel %vm279_vm2, %v2133_v35, %v2132_v18 }
 0xeb7   : > { %v1852_v21 = vpop.f32.mrf.mxu1 }
 0xeb8   : > { %v1875_v20 = vrot.slane %v1867_v19, %v3390_v24  ;;  %v2136_v14 = vsel %vm282_vm3, %v2135_v27, %v2134_v13 }
 0xeb9   : > { %v2756_v52 = vpop.f32.mrf.mxu1 }
 0xeba   : > { %v1876_v25 = vcombine.high %v1875_v20, %v1875_v20  ;;  %v1883_v2 = vrot.slane %v1875_v20, %v3390_v24 }
 0xebc   : > { %v1890_v3 = vrot.slane %v1876_v25, %v3390_v24  ;;  %v1891_v34 = vcombine.high %v1883_v2, %v1883_v2  ;;  %1897 = vst.msk [vmem:[%s3397_s5 + $0x5] sm:$0x1] %vm541_vm9, %v1883_v2 }
 0xebe   : > { %v1892_v39 = vcombine.high %v1890_v3, %v1890_v3  ;;  %1898 = vst.msk [vmem:[%s3397_s5 + $0xd] sm:$0x1] %vm541_vm9, %v1890_v3  ;;  %1899 = vst.msk [vmem:[%s3397_s5 + $0x15] sm:$0x1] %vm541_vm9, %v1891_v34 }
 0xebf   : > { %v2049_v40 = vpop.f32.mrf.mxu1 }
 0xec0   : > { %1900 = vst.msk [vmem:[%s3397_s5 + $0x1d] sm:$0x1] %vm541_vm9, %v1892_v39  ;;  %v2056_v62 = vsel %vm427_vm8, %v2049_v40, -inf }
 0xec1   : > { %2057 = vmax.xlane.f32.xlu1 %v2056_v62  ;;  %v2767_v44 = vpop.f32.mrf.mxu1 }
 0xec3   : > { %v2052_v26 = vpop.f32.mrf.mxu1 }
 0xec4   : > { %v2059_v45 = vsel %vm427_vm8, %v2052_v26, -inf }
 0xec5   : > { %2060 = vmax.xlane.f32.xlu1 %v2059_v45  ;;  %v2768_v33 = vpop.f32.mrf.mxu1 }
 0xec7   : > { %v3749_v46 = vpop.f32.mrf.mxu1 }
 0xec9   : > { %v2232_v48 = vpop.f32.mrf.mxu1 }
 0xeca   : > { %v2233_v61 = vadd.f32 %v2232_v48, %v3280_v29 }
 0xecb   : > { %v2780_v37 = vpop.f32.mrf.mxu1 }
 0xecd   : > { %v2235_v9 = vpop.f32.mrf.mxu1 }
 0xece   : > { %v2236_v12 = vadd.f32 %v2235_v9, %v3305_v47  ;;  %v2404_v9 = vrot.slane %v3690_v4, 6 }
 0xed0   : > { %v2279_v29 = vpack.c.bf16 %v2236_v12, %v2236_v12  ;;  %v2406_v12 = vrot.slane %v3698_v43, 5 }
 0xed2   : > { %v2284_v16 = vsel %vm382_vm6, %v2279_v29, 0 }
 0xf4a   : > { %v2058_v38 = vpop.xlane.xlu1 %2057 }
 0xf4b   : > { %v2062_v51 = vsub.f32 %v2049_v40, %v2058_v38 }
 0xf4d   : > { %v2064_v8 = vmul.f32 1.442695, %v2062_v51 }
 0xf4e   : > { %v2061_v49 = vpop.xlane.xlu1 %2060 }
 0xf4f   : > { %2938 = vpow2.f32 %v2064_v8  ;;  %v2063_v55 = vsub.f32 %v2052_v26, %v2061_v49 }
 0xf51   : > { %v2066_v50 = vmul.f32 1.442695, %v2063_v55 }
 0xf53   : > { %2940 = vpow2.f32 %v2066_v50 }
 0xf5c   : > { %v2939_v57 = vpop.eup %2938 }
 0xf5d   : > { %v2068_v58 = vsel %vm427_vm8, %v2939_v57, 0.0 }
 0xf5e   : > { %2069 = vadd.xlane.f32.xlu1 %v2068_v58 }
 0xf60   : > { %v2941_v53 = vpop.eup %2940 }
 0xf61   : > { %v2071_v54 = vsel %vm427_vm8, %v2941_v53, 0.0 }
 0xf62   : > { %2072 = vadd.xlane.f32.xlu0 %v2071_v54 }
 0xf91   : > { %2246 = vxpose.xlu1.b32.start.end [1/1] (short) (narrow) %v2233_v61, 16 }
 0xfe7   : > { %v2070_v23 = vpop.xlane.xlu1 %2069 }
 0xfe8   : > { %2942 = vrcp.f32 %v2070_v23 }
 0xfeb   : > { %v2073_v5 = vpop.xlane.xlu0 %2072 }
 0xfec   : > { %2944 = vrcp.f32 %v2073_v5 }
 0xff5   : > { %v2943_v31 = vpop.eup %2942 }
 0xff6   : > { %v2076_v32 = vmul.f32 %v2943_v31, %v2939_v57 }
 0xff9   : > { %v2945_v6 = vpop.eup %2944 }
 0xffa   : > { %v2077_v7 = vmul.f32 %v2945_v6, %v2941_v53  ;;  %v2241_v6 = vadd.f32 %v3749_v46, %v3357_v56 }
 0xffc   : > { %v2079_v36 = vpack.c.bf16 %v2077_v7, %v2076_v32  ;;  %v2349_v32 = vpack.c.bf16 %v2241_v6, %v2241_v6  ;;  %v2402_v7 = vrot.slane %v3687_v1, 7 }
 0xffe   : > { %v2084_v41 = vsel %vm427_vm8, %v2079_v36, 0  ;;  %v2403_v36 = vsel %vm276_vm1, %v2402_v7, %v3695_v42 }
 0xfff   : > { %2770 = vmatpush3.bf16.xpose.msra.mxu0 %v2084_v41  ;;  %v2405_v41 = vsel %vm279_vm2, %v2404_v9, %v2403_v36 }
0x1000   : > { %2781 = vmatprep.subr.bf16.mxu0 %v3085_v28  ;;  %v2407_v29 = vsel %vm282_vm3, %v2406_v12, %v2405_v41 }
0x1006   : > { %2772 = vmatmul.mubr.msk.bf16.vlgmr.msra.gmra.mxu0 %vm427_vm8, %v2078_v30 }
0x1007   : > { %2782 = vmatpush3.bf16.msra.mxu0 %v2284_v16  ;;  %2783 = vmatprep.mubr.msk.bf16.mxu0 %vm3086_vm5, %v3085_v28 }
0x100d   : > { %v2262_v10 = vpop.trf.xlu1 }
0x1011   : > { %v2263_v47 = vpop.trf.xlu1 }
0x1012   : > { %v2278_v17 = vpack.c.bf16 %v2263_v47, %v2262_v10 }
0x1014   : > { %2784 = vmatmul.mubr.msk.bf16.vlgmr.msra.gmra.mxu0 %vm378_vm7, %v2278_v17 }
0x10c6   : > { %v2120_v28 = vpop.f32.mrf.mxu0 }
0x10c7   : > { %v2126_v19 = vmul.f32 %v2120_v28, %v3386_v22 }
0x10c8   : > { %v2773_v21 = vpop.f32.mrf.mxu0 }
0x10c9   : > { %v2138_v59 = vadd.f32 %v2136_v14, %v2126_v19 }
0x10ca   : > { %v2123_v20 = vpop.f32.mrf.mxu0 }
0x10cb   : > { %v2146_v60 = vrot.slane %v2138_v59, %v3390_v24 }
0x10cc   : > { %v2774_v52 = vpop.f32.mrf.mxu0 }
0x10cd   : > { %v2147_v25 = vcombine.high %v2146_v60, %v2146_v60  ;;  %v2154_v63 = vrot.slane %v2146_v60, %v3390_v24 }
0x10cf   : > { %v2161_v0 = vrot.slane %v2147_v25, %v3390_v24  ;;  %v2162_v2 = vcombine.high %v2154_v63, %v2154_v63  ;;  %2168 = vst.msk [vmem:[%s3397_s5 + $0x6] sm:$0x1] %vm541_vm9, %v2154_v63 }
0x10d1   : > { %v2163_v3 = vcombine.high %v2161_v0, %v2161_v0  ;;  %2169 = vst.msk [vmem:[%s3397_s5 + $0xe] sm:$0x1] %vm541_vm9, %v2161_v0  ;;  %2170 = vst.msk [vmem:[%s3397_s5 + $0x16] sm:$0x1] %vm541_vm9, %v2162_v2 }
0x10d3   : > { %2171 = vst.msk [vmem:[%s3397_s5 + $0x1e] sm:$0x1] %vm541_vm9, %v2163_v3 }
0x10d4   : > { %v2320_v34 = vpop.f32.mrf.mxu0 }
0x10d5   : > { %v2327_v39 = vsel %vm427_vm8, %v2320_v34, -inf }
0x10d6   : > { %2328 = vmax.xlane.f32.xlu0 %v2327_v39  ;;  %v2785_v40 = vpop.f32.mrf.mxu0 }
0x10d8   : > { %v2323_v62 = vpop.f32.mrf.mxu0 }
0x10d9   : > { %v2330_v44 = vsel %vm427_vm8, %v2323_v62, -inf }
0x10da   : > { %2331 = vmax.xlane.f32.xlu1 %v2330_v44  ;;  %v2786_v26 = vpop.f32.mrf.mxu0 }
0x115f   : > { %v2329_v45 = vpop.xlane.xlu0 %2328 }
0x1160   : > { %v2333_v33 = vsub.f32 %v2320_v34, %v2329_v45 }
0x1162   : > { %v2335_v48 = vmul.f32 1.442695, %v2333_v33 }
0x1163   : > { %v2332_v37 = vpop.xlane.xlu1 %2331 }
0x1164   : > { %2946 = vpow2.f32 %v2335_v48  ;;  %v2334_v38 = vsub.f32 %v2323_v62, %v2332_v37 }
0x1166   : > { %v2337_v51 = vmul.f32 1.442695, %v2334_v38 }
0x1168   : > { %2948 = vpow2.f32 %v2337_v51 }
0x1171   : > { %v2947_v8 = vpop.eup %2946 }
0x1172   : > { %v2339_v49 = vsel %vm427_vm8, %v2947_v8, 0.0 }
0x1173   : > { %2340 = vadd.xlane.f32.xlu0 %v2339_v49 }
0x1175   : > { %v2949_v55 = vpop.eup %2948 }
0x1176   : > { %v2342_v50 = vsel %vm427_vm8, %v2949_v55, 0.0 }
0x1177   : > { %2343 = vadd.xlane.f32.xlu0 %v2342_v50 }
0x11fc   : > { %v2341_v57 = vpop.xlane.xlu0 %2340 }
0x11fd   : > { %2950 = vrcp.f32 %v2341_v57 }
0x1200   : > { %v2344_v58 = vpop.xlane.xlu0 %2343 }
0x1201   : > { %2952 = vrcp.f32 %v2344_v58 }
0x120a   : > { %v2951_v53 = vpop.eup %2950 }
0x120b   : > { %v2347_v61 = vmul.f32 %v2951_v53, %v2947_v8 }
0x120e   : > { %v2953_v54 = vpop.eup %2952 }
0x120f   : > { %v2348_v23 = vmul.f32 %v2953_v54, %v2949_v55 }
0x1211   : > { %v2350_v5 = vpack.c.bf16 %v2348_v23, %v2347_v61 }
0x1213   : > { %v2355_v31 = vsel %vm427_vm8, %v2350_v5, 0 }
0x1214   : > { %2788 = vmatpush3.bf16.xpose.msra.mxu1 %v2355_v31 }
0x121b   : > { %2790 = vmatmul.mubr.msk.bf16.vlgmr.msra.gmra.mxu1 %vm427_vm8, %v2349_v32 }
0x12db   : > { %v2391_v15 = vpop.f32.mrf.mxu1 }
0x12dc   : > { %v2397_v56 = vmul.f32 %v2391_v15, %v3386_v22 }
0x12dd   : > { %v2791_v46 = vpop.f32.mrf.mxu1 }
0x12de   : > { %v2409_v1 = vadd.f32 %v2407_v29, %v2397_v56 }
0x12df   : > { %v2394_v4 = vpop.f32.mrf.mxu1 }
0x12e0   : > { %v2417_v42 = vrot.slane %v2409_v1, %v3390_v24 }
0x12e1   : > { %v2792_v43 = vpop.f32.mrf.mxu1 }
0x12e2   : > { %v2418_v30 = vcombine.high %v2417_v42, %v2417_v42  ;;  %v2425_v16 = vrot.slane %v2417_v42, %v3390_v24 }
0x12e4   : > { %v2432_v10 = vrot.slane %v2418_v30, %v3390_v24  ;;  %v2433_v22 = vcombine.high %v2425_v16, %v2425_v16  ;;  %2439 = vst.msk [vmem:[%s3397_s5 + $0x7] sm:$0x1] %vm541_vm9, %v2425_v16 }
0x12e6   : > { %v2434_v47 = vcombine.high %v2432_v10, %v2432_v10  ;;  %2440 = vst.msk [vmem:[%s3397_s5 + $0xf] sm:$0x1] %vm541_vm9, %v2432_v10  ;;  %2441 = vst.msk [vmem:[%s3397_s5 + $0x17] sm:$0x1] %vm541_vm9, %v2433_v22 }
0x12e8   : > { %2442 = vst.msk [vmem:[%s3397_s5 + $0x1f] sm:$0x1] %vm541_vm9, %v2434_v47 }
0x12e9   : > { %2995 = shalt.err (!%p2992_p7)
}
0x12ea   : > { %s2996_s26 = scalar_lea.hbm %s3810_s20, 512  ;;  %s3000_s15 = scalar_lea.hbm %s3875_s4, 2048 }
0x12eb   : > { %p2997_p10 = scmp.ne.s32.totalorder %s3810_s20, %s2996_s26  ;;  %p3001_p13 = scmp.lt.s32.totalorder %s3810_s20, %s3875_s4 }
0x12ec   : > { %p3002_p1 = scmp.lt.s32.totalorder %s3000_s15, %s2996_s26 }
0x12ed   : > { %p2998_p11 = pnand %p2997_p10, %p3185_p9 }
0x12ee   : > { %p3003_p8 = por %p3002_p1, %p3001_p13 }
0x12ef   : > { %p2999_p3 = pneg %p2998_p11 }
0x12f1   : > { %p3004_p0 = pnand %p3003_p8, %p2999_p3 }
0x12f3   : > { %3007 = shalt.err (!%p3004_p0)
}
0x12f4   : > { %s3089_s3 = smov 128   ;;  %s3090_s16 = smov 256  }
0x12f5   : > { %s3091_s21 = smov 8  }
0x12f6   : > { %2803 = dma.vmem_to_hbm [thread:$0]  (%p3185_p9), %s3812_s25, 512, %s3810_s20, %s2444_s7, %s3089_s3, %s3090_s16, %s3091_s21  }
0x12f7 PF: > { %p2814_p2 = scmp.ge.s32.totalorder %s3078_s24, 2  ;;  %s2473_s29 = sand.u32 1, %s3050_s17  }
0x12f8   : > { %s2474_s28 = scalar_lea.sflag [#allocation5], %s2473_s29 }
0x12f9   : > { %p2810_p4 = pnand %p2814_p2, %p3191_p12 }
0x12fb   : > { %p2811_p5 = pneg %p2810_p4 }
0x12fd   : > { %3045 = dma.done.wait (%p2811_p5), %s2474_s28, 512  }
0x12fe   : > { %3047 = vsyncadd (%p2811_p5), %s2474_s28, 4294966784  ;;  %s21_s24 = sadd.s32 1, %s3078_s24   ;;  %s3885_s6 = sld [smem:[#allocation9_spill]] }
0x12ff   : > { %p18_p6 = scmp.ge.s32.totalorder %s21_s24, 6   ;;  %s3886_s10 = sld [smem:[#allocation10_spill]] }
0x1300   : > { %s3887_s17 = smov %s3054_s18  ;;  %s3888_s18 = smov %s3058_s19 }
0x1301   : > { %s3889_s19 = smov %s3198_s11  ;;  %s3890_s20 = smov %s3070_s22 }
0x1302   : > { %s3891_s21 = smov %s3074_s23  ;;  %20 = sbr.rel (!%p18_p6) target bundleno = 9 (0x9), region = 81 }
0x1304   : > { %s3892_s22 = smov %s3885_s6 }
0x1305   : > { %s3893_s23 = smov %s3886_s10 }
0x1307   :  { %2479 = vsyncpa [#allocation4], 1 }
0x1308   :  { %2481 = vsyncpa [#allocation4 + $0x1], 1 }
0x1309   :  { %2482 = vsyncpa [#allocation5], 1 }
0x130a   :  { %2484 = vsyncpa [#allocation5 + $0x1], 1 }

</bundles_post_ra>
